<compile_context>
chip_gen: v7x
topology: tpu7x:2x2x1
jax: 0.10.0
libtpu: 0.0.40
codegen_flags: <defaults>
</compile_context>

<pallas_src>
import functools

import jax
import jax.numpy as jnp
from jax import lax
from jax.experimental import pallas as pl
from jax.experimental.pallas import tpu as pltpu


def self_attention_kernel(x_ref, a_ref, wr_ref, wv_ref, bv_ref, gamma_ref,
                          *refs, tq, store_attn):
    # x_ref:   (C, N)  f32 slab for the current batch (resident across qt tiles)
    # a_ref:   (C, C)  f32   folded Wq^T Wk
    # wr_ref:  (1, C)  f32   folded (Wk^T bq)^T
    # wv_ref:  (C, C)  f32   bv_ref: (C, 1) f32   gamma_ref: (1, 1) f32 in SMEM
    # out_ref: (C, TQ)       attn_ref (optional): (TQ, N)
    # scratch: keff (C, N) f32, vt (N, C) f32, r (1, N) f32
    if store_attn:
        out_ref, attn_ref, keff_scr, vt_scr, r_scr = refs
    else:
        out_ref, keff_scr, vt_scr, r_scr = refs
        attn_ref = None

    qt = pl.program_id(1)

    # ---- per-batch prologue: K_eff = A @ x, r = wr @ x, V^T; cached in scratch.
    @pl.when(qt == 0)
    def _():
        x_full = x_ref[...]                                               # (C, N) f32
        keff_scr[...] = jnp.dot(a_ref[...], x_full,
                                preferred_element_type=jnp.float32)       # (C, N)
        r_scr[...] = jnp.dot(wr_ref[...], x_full,
                             preferred_element_type=jnp.float32)          # (1, N)
        v = jnp.dot(wv_ref[...], x_full,
                    preferred_element_type=jnp.float32) + bv_ref[...]     # (C, N)
        vt_scr[...] = jnp.transpose(v)                                    # (N, C)

    # ---- per query tile.
    start = pl.multiple_of(qt * tq, tq)          # lane-aligned slice of the slab
    x_tile = x_ref[:, pl.ds(start, tq)]                                   # (C, TQ) f32

    # energy[i, j] = sum_c x_tile[c, i] * K_eff[c, j] + r[j]
    energy = lax.dot_general(x_tile, keff_scr[...],
                             (((0,), (0,)), ((), ())),
                             preferred_element_type=jnp.float32)          # (TQ, N)
    energy = energy + r_scr[...]                                          # bcast (1, N)

    # Row softmax (f32, numerically stabilized); approx reciprocal on the EUP.
    m = jnp.max(energy, axis=-1, keepdims=True)
    e = jnp.exp(energy - m)
    denom = jnp.sum(e, axis=-1, keepdims=True)
    attn = e * pl.reciprocal(denom, approx=True)                          # (TQ, N) f32
    if store_attn:
        attn_ref[...] = attn.astype(attn_ref.dtype)

    # out^T = attn @ V^T ; only the small (TQ, C) result is transposed back.
    o_t = jnp.dot(attn, vt_scr[...], preferred_element_type=jnp.float32)  # (TQ, C)
    out_ref[...] = (gamma_ref[0, 0] * jnp.transpose(o_t)
                    + x_tile).astype(out_ref.dtype)                       # (C, TQ)


@functools.partial(jax.jit, static_argnames=("tq", "attn_dtype", "return_attn"))
def self_attention(x, wq, bq, wk, bk, wv, bv, gamma, *,
                   tq=256, attn_dtype=jnp.bfloat16, return_attn=True):
    """Pallas forward of SelfAttention.  x: (B, C, W, H) f32, NCHW like the module.

    Returns (out (B,C,W,H) f32, attn (B, N, N) attn_dtype or None).
    Note: bk only contributes row-constant energy terms that cancel in the
    softmax, so it is accepted for interface parity but unused.
    """
    del bk  # cancels in the row softmax (see folding derivation above)
    B, C, W, H = x.shape
    N = W * H
    tq = min(tq, N)
    # TODO(synk): pad N (and mask padded key columns) for arbitrary spatial sizes.
    assert N % tq == 0, "W*H must be divisible by the query tile size"
    n_qt = N // tq

    x_flat = x.reshape(B, C, N)
    # Host-side algebraic folding of the Q/K projections.
    a = wq.T @ wk                    # (C, C)
    wr_t = (wk.T @ bq).T             # (1, C)

    kernel = functools.partial(self_attention_kernel, tq=tq,
                               store_attn=return_attn)

    out_struct = jax.ShapeDtypeStruct((B, C, N), jnp.float32)
    out_spec = pl.BlockSpec((None, C, tq), lambda b, t: (b, 0, t))   # lane-dense cols
    if return_attn:
        out_shape = (out_struct, jax.ShapeDtypeStruct((B, N, N), attn_dtype))
        out_specs = (out_spec,
                     pl.BlockSpec((None, tq, N), lambda b, t: (b, t, 0)))
    else:
        out_shape = out_struct
        out_specs = out_spec

    res = pl.pallas_call(
        kernel,
        out_shape=out_shape,
        grid=(B, n_qt),
        in_specs=[
            pl.BlockSpec((None, C, N), lambda b, t: (b, 0, 0)),   # x slab (resident over t)
            pl.BlockSpec((C, C), lambda b, t: (0, 0)),            # A = Wq^T Wk
            pl.BlockSpec((1, C), lambda b, t: (0, 0)),            # wr^T = (Wk^T bq)^T
            pl.BlockSpec((C, C), lambda b, t: (0, 0)),            # Wv
            pl.BlockSpec((C, 1), lambda b, t: (0, 0)),            # bv
            pl.BlockSpec(memory_space=pltpu.MemorySpace.SMEM),    # gamma scalar
        ],
        out_specs=out_specs,
        scratch_shapes=[
            pltpu.VMEM((C, N), jnp.float32),   # K_eff  (per-batch, reused across tiles)
            pltpu.VMEM((N, C), jnp.float32),   # V^T
            pltpu.VMEM((1, N), jnp.float32),   # r = bq^T Wk x
        ],
        compiler_params=pltpu.CompilerParams(
            # "parallel" batch axis shards across v7x TensorCores; qt stays
            # "arbitrary" because the pl.when(qt==0) prologue fills scratch.
            dimension_semantics=("parallel", "arbitrary"),
            # 48 MiB fits all generations (v7x has 64 MiB/TC); sweep higher on v5e/v6e.
            vmem_limit_bytes=48 * 1024 * 1024),
    )(x_flat, a, wr_t, wv, bv, gamma)

    if return_attn:
        out_flat, attn = res
        return out_flat.reshape(B, C, W, H), attn
    return res.reshape(B, C, W, H), None


def init_params(key, in_dim):
    """Deterministic synthetic init matching the nn.Module shapes.

    query_conv / key_conv: Conv2d(in_dim, in_dim // 8, 1) -> (in_dim//8, in_dim) + bias
    value_conv:            Conv2d(in_dim, in_dim, 1)      -> (in_dim, in_dim)    + bias
    gamma:                 zeros(1)
    """
    c8 = in_dim // 8
    ks = jax.random.split(key, 6)
    scale = 1.0 / jnp.sqrt(in_dim)
    wq = jax.random.uniform(ks[0], (c8, in_dim), jnp.float32, -scale, scale)
    bq = jax.random.uniform(ks[1], (c8, 1), jnp.float32, -scale, scale)
    wk = jax.random.uniform(ks[2], (c8, in_dim), jnp.float32, -scale, scale)
    bk = jax.random.uniform(ks[3], (c8, 1), jnp.float32, -scale, scale)
    wv = jax.random.uniform(ks[4], (in_dim, in_dim), jnp.float32, -scale, scale)
    bv = jax.random.uniform(ks[5], (in_dim, 1), jnp.float32, -scale, scale)
    gamma = jnp.zeros((1, 1), jnp.float32)   # matches nn.Parameter(torch.zeros(1))
    return wq, bq, wk, bk, wv, bv, gamma


def ref_self_attention(x, wq, bq, wk, bk, wv, bv, gamma):
    """Pure-JAX f32 reference mirroring the PyTorch forward exactly."""
    B, C, W, H = x.shape
    N = W * H
    xf = x.reshape(B, C, N)
    q = jnp.einsum('oc,bcn->bon', wq, xf) + bq[None]      # (B, C8, N)
    k = jnp.einsum('oc,bcn->bon', wk, xf) + bk[None]      # (B, C8, N)
    v = jnp.einsum('oc,bcn->bon', wv, xf) + bv[None]      # (B, C,  N)
    energy = jnp.einsum('bcn,bcm->bnm', q, k)             # (B, N, N)
    attn = jax.nn.softmax(energy, axis=-1)
    out = jnp.einsum('bcj,bij->bci', v, attn)             # (B, C, N)
    out = gamma[0, 0] * out + xf
    return out.reshape(B, C, W, H), attn


if __name__ == "__main__":
    key = jax.random.PRNGKey(0)
    k_x, k_p = jax.random.split(key)

    B, C, W, H = 2, 32, 16, 16          # in_dim = 32 (divisible by 8), N = 256
    x = jax.random.normal(k_x, (B, C, W, H), jnp.float32)
    wq, bq, wk, bk, wv, bv, _ = init_params(k_p, C)
    # Module initializes gamma to 0 (out == x); use a non-zero gamma here so the
    # attention path is actually exercised by the check.
    gamma = jnp.full((1, 1), 0.5, jnp.float32)

    # tq=128 -> 2 query tiles per batch, exercising the per-batch scratch reuse.
    out, attn = self_attention(x, wq, bq, wk, bk, wv, bv, gamma, tq=128)
    out = jax.block_until_ready(out)
    attn = jax.block_until_ready(attn)

    out_ref, attn_ref = ref_self_attention(x, wq, bq, wk, bk, wv, bv, gamma)
    assert out.shape == (B, C, W, H) and attn.shape == (B, W * H, W * H)
    # attn is stored in bf16 (memory-traffic optimization) => bf16-scale tolerances.
    assert jnp.allclose(attn.astype(jnp.float32), attn_ref, atol=5e-3, rtol=5e-3)
    assert jnp.allclose(out, out_ref, atol=1e-2, rtol=1e-2)
    # softmax rows must still sum to ~1 (bf16 storage + approx reciprocal).
    assert jnp.allclose(jnp.sum(attn.astype(jnp.float32), axis=-1), 1.0, atol=1e-2)

    # Fast path with the (B, N, N) attention writeback skipped entirely.
    out2, none_attn = self_attention(x, wq, bq, wk, bk, wv, bv, gamma,
                                     tq=128, return_attn=False)
    out2 = jax.block_until_ready(out2)
    assert none_attn is None
    assert jnp.allclose(out2, out_ref, atol=1e-2, rtol=1e-2)

    print("KERNEL_OK")
</pallas_src>

<mosaic_0001>
module attributes {stable_mosaic.version = 11 : i64} {
  func.func @self_attention_kernel(%arg0: i32, %arg1: i32, %arg2: memref<1x32x256xf32, #tpu.memory_space<vmem>>, %arg3: memref<32x32xf32, #tpu.memory_space<vmem>>, %arg4: memref<1x32xf32, #tpu.memory_space<vmem>>, %arg5: memref<32x32xf32, #tpu.memory_space<vmem>>, %arg6: memref<32x1xf32, #tpu.memory_space<vmem>>, %arg7: memref<1x1xf32, #tpu.memory_space<smem>>, %arg8: memref<1x32x128xf32, #tpu.memory_space<vmem>>, %arg9: memref<1x128x256xbf16, #tpu.memory_space<vmem>>, %arg10: memref<32x256xf32, #tpu.memory_space<vmem>>, %arg11: memref<256x32xf32, #tpu.memory_space<vmem>>, %arg12: memref<1x256xf32, #tpu.memory_space<vmem>>) attributes {dimension_semantics = [#tpu.dimension_semantics<parallel>, #tpu.dimension_semantics<arbitrary>], iteration_bounds = array<i64: 2, 2>, scalar_prefetch = 0 : i64, scratch_operands = 3 : i64, tpu.core_type = #tpu.core_type<tc>, window_params = [{transform_indices = @transform_0, window_bounds = array<i64: 1, 32, 256>}, {pipeline_mode = #tpu.pipeline_mode<synchronous>, transform_indices = @transform_1, window_bounds = array<i64: 32, 32>}, {pipeline_mode = #tpu.pipeline_mode<synchronous>, transform_indices = @transform_2, window_bounds = array<i64: 1, 32>}, {pipeline_mode = #tpu.pipeline_mode<synchronous>, transform_indices = @transform_3, window_bounds = array<i64: 32, 32>}, {pipeline_mode = #tpu.pipeline_mode<synchronous>, transform_indices = @transform_4, window_bounds = array<i64: 32, 1>}, {transform_indices = @transform_5, window_bounds = array<i64: 1, 1>}, {transform_indices = @transform_6, window_bounds = array<i64: 1, 32, 128>}, {transform_indices = @transform_7, window_bounds = array<i64: 1, 128, 256>}]} {
    %c0_i32 = arith.constant 0 : i32
    %0 = arith.cmpi eq, %arg1, %c0_i32 : i32
    %1 = arith.extui %0 : i1 to i32
    %c0_i32_0 = arith.constant 0 : i32
    %2 = arith.cmpi ne, %1, %c0_i32_0 : i32
    scf.if %2 {
      %c0_19 = arith.constant 0 : index
      %c0_20 = arith.constant 0 : index
      %c0_21 = arith.constant 0 : index
      %37 = vector.load %arg2[%c0_19, %c0_20, %c0_21] : memref<1x32x256xf32, #tpu.memory_space<vmem>>, vector<1x32x256xf32>
      %38 = vector.shape_cast %37 : vector<1x32x256xf32> to vector<32x256xf32>
      %c0_22 = arith.constant 0 : index
      %c0_23 = arith.constant 0 : index
      %39 = vector.load %arg3[%c0_22, %c0_23] : memref<32x32xf32, #tpu.memory_space<vmem>>, vector<32x32xf32>
      %cst_24 = arith.constant dense<0.000000e+00> : vector<32x256xf32>
      %40 = tpu.matmul %39, %38, %cst_24 {dimension_numbers = #tpu.dot_dimension_numbers<[1], [0], [0], [1], [0, 0, 1, 1], [], []>} : vector<32x32xf32>, vector<32x256xf32>, vector<32x256xf32> -> vector<32x256xf32>
      %c0_25 = arith.constant 0 : index
      %c0_26 = arith.constant 0 : index
      %41 = vector.load %arg10[%c0_25, %c0_26] : memref<32x256xf32, #tpu.memory_space<vmem>>, vector<32x256xf32>
      tpu.vector_store %arg10[%c0_25, %c0_26], %40 {strides = array<i32>} : memref<32x256xf32, #tpu.memory_space<vmem>>, vector<32x256xf32>,
      %c0_27 = arith.constant 0 : index
      %c0_28 = arith.constant 0 : index
      %42 = vector.load %arg4[%c0_27, %c0_28] : memref<1x32xf32, #tpu.memory_space<vmem>>, vector<1x32xf32>
      %cst_29 = arith.constant dense<0.000000e+00> : vector<1x256xf32>
      %43 = tpu.matmul %42, %38, %cst_29 {dimension_numbers = #tpu.dot_dimension_numbers<[1], [0], [0], [1], [0, 0, 1, 1], [], []>} : vector<1x32xf32>, vector<32x256xf32>, vector<1x256xf32> -> vector<1x256xf32>
      %c0_30 = arith.constant 0 : index
      %c0_31 = arith.constant 0 : index
      %44 = vector.load %arg12[%c0_30, %c0_31] : memref<1x256xf32, #tpu.memory_space<vmem>>, vector<1x256xf32>
      tpu.vector_store %arg12[%c0_30, %c0_31], %43 {strides = array<i32>} : memref<1x256xf32, #tpu.memory_space<vmem>>, vector<1x256xf32>,
      %c0_32 = arith.constant 0 : index
      %c0_33 = arith.constant 0 : index
      %45 = vector.load %arg5[%c0_32, %c0_33] : memref<32x32xf32, #tpu.memory_space<vmem>>, vector<32x32xf32>
      %cst_34 = arith.constant dense<0.000000e+00> : vector<32x256xf32>
      %46 = tpu.matmul %45, %38, %cst_34 {dimension_numbers = #tpu.dot_dimension_numbers<[1], [0], [0], [1], [0, 0, 1, 1], [], []>} : vector<32x32xf32>, vector<32x256xf32>, vector<32x256xf32> -> vector<32x256xf32>
      %c0_35 = arith.constant 0 : index
      %c0_36 = arith.constant 0 : index
      %47 = vector.load %arg6[%c0_35, %c0_36] : memref<32x1xf32, #tpu.memory_space<vmem>>, vector<32x1xf32>
      %48 = vector.broadcast %47 : vector<32x1xf32> to vector<32x256xf32>
      %49 = arith.addf %46, %48 : vector<32x256xf32>
      %50 = tpu.transpose %49, [1, 0] : vector<32x256xf32> -> vector<256x32xf32>
      %c0_37 = arith.constant 0 : index
      %c0_38 = arith.constant 0 : index
      %51 = vector.load %arg11[%c0_37, %c0_38] : memref<256x32xf32, #tpu.memory_space<vmem>>, vector<256x32xf32>
      tpu.vector_store %arg11[%c0_37, %c0_38], %50 {strides = array<i32>} : memref<256x32xf32, #tpu.memory_space<vmem>>, vector<256x32xf32>,
    } else {
    }
    %c128_i32 = arith.constant 128 : i32
    %3 = arith.muli %arg1, %c128_i32 : i32
    %4 = tpu.assume_multiple %3, 128 : i32
    %c0 = arith.constant 0 : index
    %c0_1 = arith.constant 0 : index
    %5 = arith.index_cast %4 : i32 to index
    %6 = vector.load %arg2[%c0, %c0_1, %5] : memref<1x32x256xf32, #tpu.memory_space<vmem>>, vector<1x32x128xf32>
    %7 = vector.shape_cast %6 : vector<1x32x128xf32> to vector<32x128xf32>
    %c0_2 = arith.constant 0 : index
    %c0_3 = arith.constant 0 : index
    %8 = vector.load %arg10[%c0_2, %c0_3] : memref<32x256xf32, #tpu.memory_space<vmem>>, vector<32x256xf32>
    %cst = arith.constant dense<0.000000e+00> : vector<128x256xf32>
    %9 = tpu.matmul %7, %8, %cst {dimension_numbers = #tpu.dot_dimension_numbers<[0], [0], [1], [1], [0, 1, 1, 1], [], []>} : vector<32x128xf32>, vector<32x256xf32>, vector<128x256xf32> -> vector<128x256xf32>
    %c0_4 = arith.constant 0 : index
    %c0_5 = arith.constant 0 : index
    %10 = vector.load %arg12[%c0_4, %c0_5] : memref<1x256xf32, #tpu.memory_space<vmem>>, vector<1x256xf32>
    %11 = vector.broadcast %10 : vector<1x256xf32> to vector<128x256xf32>
    %12 = arith.addf %9, %11 : vector<128x256xf32>
    %cst_6 = arith.constant dense<0xFF800000> : vector<128xf32>
    %13 = vector.multi_reduction <maximumf>, %12, %cst_6 [1] : vector<128x256xf32> to vector<128xf32>
    %14 = vector.shape_cast %13 : vector<128xf32> to vector<128x1xf32>
    %15 = vector.broadcast %14 : vector<128x1xf32> to vector<128x256xf32>
    %16 = arith.subf %12, %15 : vector<128x256xf32>
    %17 = math.exp %16 : vector<128x256xf32>
    %cst_7 = arith.constant dense<0.000000e+00> : vector<128xf32>
    %18 = vector.multi_reduction <add>, %17, %cst_7 [1] : vector<128x256xf32> to vector<128xf32>
    %19 = vector.shape_cast %18 : vector<128xf32> to vector<128x1xf32>
    %20 = tpu.reciprocal %19 {approx = true} : vector<128x1xf32> -> vector<128x1xf32>
    %21 = vector.broadcast %20 : vector<128x1xf32> to vector<128x256xf32>
    %22 = arith.mulf %17, %21 : vector<128x256xf32>
    %23 = arith.truncf %22 : vector<128x256xf32> to vector<128x256xbf16>
    %c0_8 = arith.constant 0 : index
    %c0_9 = arith.constant 0 : index
    %c0_10 = arith.constant 0 : index
    %24 = vector.load %arg9[%c0_8, %c0_9, %c0_10] : memref<1x128x256xbf16, #tpu.memory_space<vmem>>, vector<1x128x256xbf16>
    %25 = vector.shape_cast %24 : vector<1x128x256xbf16> to vector<128x256xbf16>
    %26 = vector.shape_cast %23 : vector<128x256xbf16> to vector<1x128x256xbf16>
    tpu.vector_store %arg9[%c0_8, %c0_9, %c0_10], %26 {strides = array<i32>} : memref<1x128x256xbf16, #tpu.memory_space<vmem>>, vector<1x128x256xbf16>,
    %c0_11 = arith.constant 0 : index
    %c0_12 = arith.constant 0 : index
    %27 = vector.load %arg11[%c0_11, %c0_12] : memref<256x32xf32, #tpu.memory_space<vmem>>, vector<256x32xf32>
    %cst_13 = arith.constant dense<0.000000e+00> : vector<128x32xf32>
    %28 = tpu.matmul %22, %27, %cst_13 {dimension_numbers = #tpu.dot_dimension_numbers<[1], [0], [0], [1], [0, 0, 1, 1], [], []>} : vector<128x256xf32>, vector<256x32xf32>, vector<128x32xf32> -> vector<128x32xf32>
    %c0_14 = arith.constant 0 : index
    %c0_15 = arith.constant 0 : index
    %29 = memref.load %arg7[%c0_14, %c0_15] : memref<1x1xf32, #tpu.memory_space<smem>>
    %30 = tpu.transpose %28, [1, 0] : vector<128x32xf32> -> vector<32x128xf32>
    %31 = vector.broadcast %29 : f32 to vector<32x128xf32>
    %32 = arith.mulf %31, %30 : vector<32x128xf32>
    %33 = arith.addf %32, %7 : vector<32x128xf32>
    %c0_16 = arith.constant 0 : index
    %c0_17 = arith.constant 0 : index
    %c0_18 = arith.constant 0 : index
    %34 = vector.load %arg8[%c0_16, %c0_17, %c0_18] : memref<1x32x128xf32, #tpu.memory_space<vmem>>, vector<1x32x128xf32>
    %35 = vector.shape_cast %34 : vector<1x32x128xf32> to vector<32x128xf32>
    %36 = vector.shape_cast %33 : vector<32x128xf32> to vector<1x32x128xf32>
    tpu.vector_store %arg8[%c0_16, %c0_17, %c0_18], %36 {strides = array<i32>} : memref<1x32x128xf32, #tpu.memory_space<vmem>>, vector<1x32x128xf32>,
    return
  }
  func.func @transform_0(%arg0: i32, %arg1: i32) -> (i32, i32, i32) {
    %c0_i32 = arith.constant 0 : i32
    %c0_i32_0 = arith.constant 0 : i32
    %c0_i32_1 = arith.constant 0 : i32
    return %arg0, %c0_i32, %c0_i32_0 : i32, i32, i32
  }
  func.func @transform_1(%arg0: i32, %arg1: i32) -> (i32, i32) {
    %c0_i32 = arith.constant 0 : i32
    %c0_i32_0 = arith.constant 0 : i32
    %c0_i32_1 = arith.constant 0 : i32
    return %c0_i32, %c0_i32_0 : i32, i32
  }
  func.func @transform_2(%arg0: i32, %arg1: i32) -> (i32, i32) {
    %c0_i32 = arith.constant 0 : i32
    %c0_i32_0 = arith.constant 0 : i32
    %c0_i32_1 = arith.constant 0 : i32
    return %c0_i32, %c0_i32_0 : i32, i32
  }
  func.func @transform_3(%arg0: i32, %arg1: i32) -> (i32, i32) {
    %c0_i32 = arith.constant 0 : i32
    %c0_i32_0 = arith.constant 0 : i32
    %c0_i32_1 = arith.constant 0 : i32
    return %c0_i32, %c0_i32_0 : i32, i32
  }
  func.func @transform_4(%arg0: i32, %arg1: i32) -> (i32, i32) {
    %c0_i32 = arith.constant 0 : i32
    %c0_i32_0 = arith.constant 0 : i32
    %c0_i32_1 = arith.constant 0 : i32
    return %c0_i32, %c0_i32_0 : i32, i32
  }
  func.func @transform_5(%arg0: i32, %arg1: i32) -> (i32, i32) {
    %c0_i32 = arith.constant 0 : i32
    %c0_i32_0 = arith.constant 0 : i32
    %c0_i32_1 = arith.constant 0 : i32
    return %c0_i32, %c0_i32_0 : i32, i32
  }
  func.func @transform_6(%arg0: i32, %arg1: i32) -> (i32, i32, i32) {
    %c0_i32 = arith.constant 0 : i32
    %c0_i32_0 = arith.constant 0 : i32
    return %arg0, %c0_i32, %arg1 : i32, i32, i32
  }
  func.func @transform_7(%arg0: i32, %arg1: i32) -> (i32, i32, i32) {
    %c0_i32 = arith.constant 0 : i32
    %c0_i32_0 = arith.constant 0 : i32
    return %arg0, %arg1, %c0_i32 : i32, i32, i32
  }
}

</mosaic_0001>

<bundles_post_ra>
// kernel: self_attention.1
= control target key start
LH: loop header
LB: loop body
LE: loop exit
PB: predicated region body
PF: predicated region fallthrough
CT: control target
= control target key end

     0   :  { %s2948_s0 = inlined_call_operand.vmem [shape: f32[2,32,256], index: 0, kind: input, shape index: {}]   ;;  %s2949_s1 = inlined_call_operand.vmem [shape: f32[32,32], index: 1, kind: input, shape index: {}]   ;;  %s2950_s2 = inlined_call_operand.vmem [shape: f32[1,32], index: 2, kind: input, shape index: {}]   ;;  %s2951_s3 = inlined_call_operand.vmem [shape: f32[32,32], index: 3, kind: input, shape index: {}]   ;;  %s2952_s4 = inlined_call_operand.vmem [shape: f32[32,1], index: 4, kind: input, shape index: {}]   ;;  %s2953_s5 = inlined_call_operand.<no memory space> [shape: f32[1,1], index: 5, kind: input, shape index: {}]   ;;  %s2954_s6 = inlined_call_operand.vmem [shape: f32[2,32,256], index: 6, kind: output, shape index: {0}]   ;;  %s2955_s7 = inlined_call_operand.hbm [shape: bf16[2,256,256], index: 7, kind: output, shape index: {1}]  }
   0x1   :  { %2956 = sst [smem:[#allocation10_spill]] %s2948_s0 }
   0x2   :  { %2957 = sst [smem:[#allocation11_spill]] %s2949_s1 }
   0x3   :  { %13 = sst [smem:[#allocation5]] %s2953_s5 }
   0x4   :  { %14 = vsyncpa [#allocation8], 0 }
   0x5   :  { %16 = vsyncpa [#allocation8 + $0x1], 0  ;;  %s2343_s26 = smov 0   ;;  %s2345_s27 = smov 0  }
   0x6   :  { %s2347_s28 = smov 0   ;;  %s2349_s29 = smov 0  }
   0x7   :  { %s2351_s30 = smov 0   ;;  %s2353_s8 = smov 0  }
   0x8   :  { %s2355_s9 = smov 0   ;;  %s2357_s10 = smov 0  }
   0x9 LB: > { %s1777_s5 = sadd.s32 4294967295, %s2291_s10   ;;  %s1778_s11 = sadd.s32 4294967294, %s2291_s10   ;;  %s2291_s10 = sphi %s2357_s10, %s22_s10   ;;  %s2287_s9 = sphi %s2355_s9, %s2969_s9   ;;  %s2283_s8 = sphi %s2353_s8, %s2968_s8   ;;  %s2279_s30 = sphi %s2351_s30, %s2967_s30   ;;  %s2275_s29 = sphi %s2349_s29, %s2966_s29   ;;  %s2271_s28 = sphi %s2347_s28, %s2965_s28   ;;  %s2267_s27 = sphi %s2345_s27, %s2964_s27   ;;  %s2263_s26 = sphi %s2343_s26, %s2963_s26  }
   0xa   : > { %s31_s12 = sadd.s32 1, %s2283_s8  ;;  %s34_s13 = sadd.s32 1, %s2287_s9 }
   0xb   : > { %p32_p0 = scmp.ge.s32.totalorder %s31_s12, 2  ;;  %p184_p1 = scmp.ne.s32.totalorder %s2271_s28, %s2267_s27 }
   0xc   : > { %p185_p2 = scmp.eq.s32.totalorder %s1777_s5, 3  ;;  %p218_p5 = scmp.ne.s32.totalorder %s2267_s27, %s2263_s26 }
   0xd   : > { %s2971_s12 = smov (%p32_p0, %s31_s12), 0  ;;  %s2973_s13 = smov (!%p32_p0, %s34_s13), %s2287_s9 }
   0xe   : > { %s170_s14 = ssub.s32 %s2283_s8, %s2971_s12  ;;  %p2394_p3 = por %p185_p2, %p184_p1 }
   0xf   : > { %p36_p4 = scmp.ge.s32.totalorder %s2973_s13, 2  ;;  %p219_p6 = scmp.eq.s32.totalorder %s1778_s11, 3 }
  0x10   : > { %p1781_p7 = scmp.ge.s32.totalorder %s2291_s10, 1  ;;  %p260_p9 = scmp.lt.s32.totalorder %s2291_s10, 5 }
  0x11   : > { %s2975_s13 = smov (%p36_p4, %s2973_s13), 0  ;;  %p2403_p8 = por %p219_p6, %p218_p5 }
  0x12   : > { %s169_s17 = ssub.s32 %s2287_s9, %s2975_s13  ;;  %s174_s18 = sadd.s32 1, %s2271_s28 }
  0x13   : > { %s171_s19 = sor.u32 %s170_s14, %s169_s17  ;;  %p261_p10 = pnand %p1781_p7, %p260_p9 }
  0x14   : > { %p172_p11 = scmp.eq.s32.totalorder %s171_s19, 0  ;;  %s2415_s21 = sand.u32 (!%p261_p10), 1, %s2267_s27  }
  0x15   : > { %264 = sbr.rel (%p261_p10) target bundleno = 1512 (0x5e8), region = 44  ;;  %p296_p12 = scmp.lt.s32.totalorder (!%p261_p10), %s2279_s30, 1 }
  0x16   : > { %s2412_s20 = scalar_select %p172_p11, %s2271_s28, %s174_s18  }
  0x17   : > { %s1782_s22 = sshll.u32 (!%p261_p10), %s2415_s21, 5  ;;  %s1783_s23 = sshll.u32 (!%p261_p10), %s2415_s21, 7 }
  0x18   : > { %s2960_s0 = sld [smem:[#allocation10_spill]] (!%p261_p10)  ;;  %s2426_s17 = scalar_lea.vmem (!%p261_p10), [#allocation6], %s1782_s22 }
  0x19   : > { %s2428_s18 = scalar_lea.vmem (!%p261_p10), [#allocation7], %s1783_s23  ;;  %p1786_p13 = scmp.ne.s32.totalorder (!%p261_p10), %s2275_s29, 0 }
  0x1c   : > { %s297_s24 = scalar_select %p296_p12, %s2279_s30, 1 }
  0x1d   : > { %305 = sbr.rel (%p1786_p13) target bundleno = 448 (0x1c0), region = 48  ;;  %v2293_v7 = vmov (!%p1786_p13), 0.0   ;;  %v2294_v8 = vmov (!%p1786_p13), 0   ;;  %v530_v14 = vld [vmem:[%s2952_s4] sm:$0xff] (!%p1786_p13)  ;;  %v532_v15 = vld [vmem:[%s2952_s4 + $0x10] sm:$0xff] (!%p1786_p13)  ;;  %v531_v16 = vld [vmem:[%s2952_s4 + $0x8] sm:$0xff] (!%p1786_p13)  ;;  %v509_v57 = vlaneseq (!%p1786_p13) }
  0x1e   : > { %s1840_s25 = sshll.u32 %s297_s24, 6  ;;  %630 = vmatprep.mubr.f32.mxu1 (!%p1786_p13), %v2293_v7  ;;  %2095 = vset.pattern.permute.xlu0 (!%p1786_p13), %v2294_v8  ;;  %v533_v17 = vld [vmem:[%s2952_s4 + $0x18] sm:$0xff] (!%p1786_p13)  ;;  %vm318_vm0 = vcmask (!%p1786_p13), 261120   ;;  %v526_v18 = vld [vmem:[%s2951_s3] sm:$0xff] (!%p1786_p13)  ;;  %s2961_s1 = sld [smem:[#allocation11_spill]] (!%p1786_p13)  ;;  %v527_v20 = vld [vmem:[%s2951_s3 + $0x8] sm:$0xff] (!%p1786_p13) }
  0x1f   : > { %s2424_s14 = scalar_lea.vmem %s2960_s0, %s1840_s25  ;;  %2096 = vset.pattern.permute.xlu1 (!%p1786_p13), %v2294_v8  ;;  %395 = vmatprep.mubr.f32.mxu0 (!%p1786_p13), %v2293_v7  ;;  %v528_v22 = vld [vmem:[%s2951_s3 + $0x10] sm:$0xff] (!%p1786_p13)  ;;  %v529_v24 = vld [vmem:[%s2951_s3 + $0x18] sm:$0xff] (!%p1786_p13)  ;;  %v428_v26 = vld [vmem:[%s2950_s2] sm:$0x1] (!%p1786_p13)  ;;  %v2295_v55 = vmov (!%p1786_p13), 1966171168  }
  0x20   : > { %v307_v0 = vld [vmem:[%s2424_s14 + $0x8] sm:$0xff] (!%p1786_p13)  ;;  %v309_v1 = vld [vmem:[%s2424_s14 + $0x18] sm:$0xff] (!%p1786_p13)  ;;  %v306_v2 = vld [vmem:[%s2424_s14] sm:$0xff] (!%p1786_p13)  ;;  %536 = vperm.xlu0 (!%p1786_p13), %2095, %v530_v14   ;;  %546 = vperm.xlu1 (!%p1786_p13), %2096, %v532_v15   ;;  %v507_v56 = vunpack.c.l.s4 (!%p1786_p13), %v2295_v55  ;;  %v510_v60 = vshrl.u32 (!%p1786_p13), %v509_v57, 7  ;;  %vm523_vm1 = vcmp.lt.s32.totalorder (!%p1786_p13), %v509_v57, 256 }
  0x21   : > { %v1938_v3 = vpack.c.bf16 (!%p1786_p13), %v309_v1, %v307_v0  ;;  %v308_v4 = vld [vmem:[%s2424_s14 + $0x10] sm:$0xff] (!%p1786_p13)  ;;  %v311_v5 = vld [vmem:[%s2424_s14 + $0x28] sm:$0xff] (!%p1786_p13)  ;;  %v313_v6 = vld [vmem:[%s2424_s14 + $0x38] sm:$0xff] (!%p1786_p13) }
  0x22   : > { %v1940_v9 = vpack.c.bf16 (!%p1786_p13), %v308_v4, %v306_v2  ;;  %v1942_v10 = vpack.c.bf16 (!%p1786_p13), %v313_v6, %v311_v5  ;;  %v310_v11 = vld [vmem:[%s2424_s14 + $0x20] sm:$0xff] (!%p1786_p13)  ;;  %v312_v12 = vld [vmem:[%s2424_s14 + $0x30] sm:$0xff] (!%p1786_p13)  ;;  %v508_v59 = vunpack.c.0.s8 (!%p1786_p13), %v507_v56 }
  0x23   : > { %1955 = vmatprep.subr.bf16.mxu1 (!%p1786_p13), %v1938_v3  ;;  %1939 = vmatprep.subr.bf16.mxu0 (!%p1786_p13), %v1938_v3  ;;  %v1944_v13 = vpack.c.bf16 (!%p1786_p13), %v312_v12, %v310_v11 }
  0x24   : > { %1957 = vmatpush1.bf16.msra.mxu1 %v1940_v9  ;;  %1941 = vmatpush1.bf16.msra.mxu0 %v1940_v9  ;;  %v314_v19 = vld [vmem:[%s2961_s1] sm:$0xff]  ;;  %v315_v21 = vld [vmem:[%s2961_s1 + $0x8] sm:$0xff]  ;;  %v316_v23 = vld [vmem:[%s2961_s1 + $0x10] sm:$0xff]  ;;  %v511_v63 = vsub.s32 %v508_v59, %v510_v60 }
  0x25   : > { %1959 = vmatprep.subr.bf16.mxu1 %v1942_v10  ;;  %1943 = vmatprep.subr.bf16.mxu0 %v1942_v10  ;;  %v317_v25 = vld [vmem:[%s2961_s1 + $0x18] sm:$0xff] }
  0x26   : > { %541 = vperm.xlu0 %2095, %v531_v16   ;;  %551 = vperm.xlu1 %2096, %v533_v17  }
  0x28   : > { %1961 = vmatpush1.bf16.msra.mxu1 %v1944_v13  ;;  %1945 = vmatpush1.bf16.msra.mxu0 %v1944_v13 }
  0x29   : > { %1947 = vmatprep.subr.bf16.mxu0 %v1938_v3 }
  0x2b   : > { %1792 = vmatmul.mubr.msk.f32.vlgmr.msra.gmra.mrb[0].mxu1 %vm318_vm0, %v526_v18  ;;  %1787 = vmatmul.mubr.msk.f32.vlgmr.msra.gmra.mrb[0].mxu0 %vm318_vm0, %v314_v19 }
  0x2c   : > { %636 = vmatprep.mubr.f32.mxu1 %v2293_v7  ;;  %1949 = vmatpush1.bf16.msra.mxu0 %v1940_v9 }
  0x2d   : > { %401 = vmatprep.mubr.f32.mxu0 %v2293_v7  ;;  %1951 = vmatprep.subr.bf16.mxu0 %v1942_v10 }
  0x2f   : > { %1793 = vmatmul.mubr.msk.f32.gmra.mrb[2].mxu1 %vm318_vm0, %v527_v20  ;;  %1788 = vmatmul.mubr.msk.f32.gmra.mrb[2].mxu0 %vm318_vm0, %v315_v21 }
  0x30   : > { %642 = vmatprep.mubr.f32.mxu1 %v2293_v7  ;;  %407 = vmatprep.mubr.f32.mxu0 %v2293_v7 }
  0x31   : > { %1953 = vmatpush1.bf16.msra.mxu0 %v1944_v13 }
  0x33   : > { %1794 = vmatmul.mubr.msk.f32.gmra.mrb[4].mxu1 %vm318_vm0, %v528_v22  ;;  %1789 = vmatmul.mubr.msk.f32.gmra.mrb[4].mxu0 %vm318_vm0, %v316_v23 }
  0x34   : > { %648 = vmatprep.mubr.f32.mxu1 %v2293_v7  ;;  %413 = vmatprep.mubr.f32.mxu0 %v2293_v7 }
  0x37   : > { %1795 = vmatmul.mubr.msk.f32.gmra.mrb[6].mxu1 %vm318_vm0, %v529_v24  ;;  %1790 = vmatmul.mubr.msk.f32.gmra.mrb[6].mxu0 %vm318_vm0, %v317_v25 }
  0x38   : > { %496 = vmatprep.mubr.f32.mxu0 %v2293_v7 }
  0x3b   : > { %1791 = vmatmul.mubr.msk.f32.vlgmr.msra.gmra.mrb[8].mxu0 %vm318_vm0, %v428_v26 }
  0x9f   : > { %v537_v27 = vpop.permute.xlu0 %536  ;;  %v547_v36 = vpop.permute.xlu1 %546 }
  0xa5   : > { %v542_v32 = vpop.permute.xlu0 %541  ;;  %v552_v42 = vpop.permute.xlu1 %551 }
  0xfe   : > { %v632_v28 = vpop.f32.mrb[0].mxu1  ;;  %v397_v47 = vpop.f32.mrb[0].mxu0 }
  0xff   : > { %v633_v29 = vadd.f32 %v632_v28, %v537_v27  ;;  %v634_v30 = vpop.f32.mrb[1].mxu1  ;;  %420 = vst [vmem:[#allocation2] sm:$0xff] %v397_v47  ;;  %v399_v48 = vpop.f32.mrb[1].mxu0 }
 0x100   : > { %v635_v31 = vadd.f32 %v634_v30, %v537_v27  ;;  %421 = vst [vmem:[#allocation2 + $0x8] sm:$0xff] %v399_v48 }
 0x101   : > { %655 = vxpose.xlu0.b32.start [1/4] (short) %v633_v29, 128 }
 0x102   : > { %v638_v33 = vpop.f32.mrb[2].mxu1  ;;  %687 = vxpose.xlu1.b32.start [1/4] (short) %v635_v31, 128  ;;  %v403_v49 = vpop.f32.mrb[2].mxu0 }
 0x103   : > { %v639_v34 = vadd.f32 %v638_v33, %v542_v32  ;;  %v640_v35 = vpop.f32.mrb[3].mxu1  ;;  %422 = vst [vmem:[#allocation2 + $0x10] sm:$0xff] %v403_v49  ;;  %v405_v50 = vpop.f32.mrb[3].mxu0 }
 0x104   : > { %v641_v37 = vadd.f32 %v640_v35, %v542_v32  ;;  %423 = vst [vmem:[#allocation2 + $0x18] sm:$0xff] %v405_v50 }
 0x105   : > { %656 = vxpose.xlu0.b32.cont [2/4] (short) %v639_v34, 128 }
 0x106   : > { %v644_v38 = vpop.f32.mrb[4].mxu1  ;;  %688 = vxpose.xlu1.b32.cont [2/4] (short) %v641_v37, 128  ;;  %v409_v51 = vpop.f32.mrb[4].mxu0 }
 0x107   : > { %v645_v39 = vadd.f32 %v644_v38, %v547_v36  ;;  %v646_v40 = vpop.f32.mrb[5].mxu1  ;;  %424 = vst [vmem:[#allocation2 + $0x20] sm:$0xff] %v409_v51  ;;  %v411_v52 = vpop.f32.mrb[5].mxu0 }
 0x108   : > { %v647_v41 = vadd.f32 %v646_v40, %v547_v36  ;;  %425 = vst [vmem:[#allocation2 + $0x28] sm:$0xff] %v411_v52 }
 0x109   : > { %657 = vxpose.xlu0.b32.cont [3/4] (short) %v645_v39, 128 }
 0x10a   : > { %v650_v43 = vpop.f32.mrb[6].mxu1  ;;  %689 = vxpose.xlu1.b32.cont [3/4] (short) %v647_v41, 128  ;;  %v415_v53 = vpop.f32.mrb[6].mxu0 }
 0x10b   : > { %v651_v44 = vadd.f32 %v650_v43, %v552_v42  ;;  %v652_v45 = vpop.f32.mrb[7].mxu1  ;;  %426 = vst [vmem:[#allocation2 + $0x30] sm:$0xff] %v415_v53  ;;  %v417_v54 = vpop.f32.mrb[7].mxu0 }
 0x10c   : > { %v653_v46 = vadd.f32 %v652_v45, %v552_v42  ;;  %427 = vst [vmem:[#allocation2 + $0x38] sm:$0xff] %v417_v54 }
 0x10d   : > { %658 = vxpose.xlu0.b32.end [4/4] (short) %v651_v44, 128 }
 0x10e   : > { %690 = vxpose.xlu1.b32.end [4/4] (short) %v653_v46, 128  ;;  %v498_v58 = vpop.f32.mrb[8].mxu0 }
 0x10f   : > { %v500_v61 = vpop.f32.mrb[9].mxu0 }
 0x110   : > { %v505_v62 = vcombine.low %v498_v58, %v500_v61 }
 0x112   : > { %v512_v0 = vrot.slane %v505_v62, %v511_v63 }
 0x114   : > { %v519_v1 = vrot.slane %v512_v0, %v511_v63 }
 0x116   : > { %525 = vst.msk [vmem:[#allocation4] sm:$0x3] %vm523_vm1, %v519_v1 }
 0x181   : > { %v671_v2 = vpop.trf.xlu0 }
 0x182   : > { %v703_v3 = vpop.trf.xlu1  ;;  %719 = vst.msk [vmem:[#allocation3] sm:$0xff] %vm318_vm0, %v671_v2 }
 0x183   : > { %735 = vst.msk [vmem:[#allocation3 + $0x80] sm:$0xff] %vm318_vm0, %v703_v3 }
 0x185   : > { %v672_v4 = vpop.trf.xlu0 }
 0x186   : > { %v704_v5 = vpop.trf.xlu1  ;;  %720 = vst.msk [vmem:[#allocation3 + $0x8] sm:$0xff] %vm318_vm0, %v672_v4 }
 0x187   : > { %736 = vst.msk [vmem:[#allocation3 + $0x88] sm:$0xff] %vm318_vm0, %v704_v5 }
 0x189   : > { %v673_v6 = vpop.trf.xlu0 }
 0x18a   : > { %v705_v7 = vpop.trf.xlu1  ;;  %721 = vst.msk [vmem:[#allocation3 + $0x10] sm:$0xff] %vm318_vm0, %v673_v6 }
 0x18b   : > { %737 = vst.msk [vmem:[#allocation3 + $0x90] sm:$0xff] %vm318_vm0, %v705_v7 }
 0x18d   : > { %v674_v8 = vpop.trf.xlu0 }
 0x18e   : > { %v706_v9 = vpop.trf.xlu1  ;;  %722 = vst.msk [vmem:[#allocation3 + $0x18] sm:$0xff] %vm318_vm0, %v674_v8 }
 0x18f   : > { %738 = vst.msk [vmem:[#allocation3 + $0x98] sm:$0xff] %vm318_vm0, %v706_v9 }
 0x191   : > { %v675_v10 = vpop.trf.xlu0 }
 0x192   : > { %v707_v11 = vpop.trf.xlu1  ;;  %723 = vst.msk [vmem:[#allocation3 + $0x20] sm:$0xff] %vm318_vm0, %v675_v10 }
 0x193   : > { %739 = vst.msk [vmem:[#allocation3 + $0xa0] sm:$0xff] %vm318_vm0, %v707_v11 }
 0x195   : > { %v676_v12 = vpop.trf.xlu0 }
 0x196   : > { %v708_v13 = vpop.trf.xlu1  ;;  %724 = vst.msk [vmem:[#allocation3 + $0x28] sm:$0xff] %vm318_vm0, %v676_v12 }
 0x197   : > { %740 = vst.msk [vmem:[#allocation3 + $0xa8] sm:$0xff] %vm318_vm0, %v708_v13 }
 0x199   : > { %v677_v14 = vpop.trf.xlu0 }
 0x19a   : > { %v709_v15 = vpop.trf.xlu1  ;;  %725 = vst.msk [vmem:[#allocation3 + $0x30] sm:$0xff] %vm318_vm0, %v677_v14 }
 0x19b   : > { %741 = vst.msk [vmem:[#allocation3 + $0xb0] sm:$0xff] %vm318_vm0, %v709_v15 }
 0x19d   : > { %v678_v16 = vpop.trf.xlu0 }
 0x19e   : > { %v710_v17 = vpop.trf.xlu1  ;;  %726 = vst.msk [vmem:[#allocation3 + $0x38] sm:$0xff] %vm318_vm0, %v678_v16 }
 0x19f   : > { %742 = vst.msk [vmem:[#allocation3 + $0xb8] sm:$0xff] %vm318_vm0, %v710_v17 }
 0x1a1   : > { %v679_v18 = vpop.trf.xlu0 }
 0x1a2   : > { %v711_v19 = vpop.trf.xlu1  ;;  %727 = vst.msk [vmem:[#allocation3 + $0x40] sm:$0xff] %vm318_vm0, %v679_v18 }
 0x1a3   : > { %743 = vst.msk [vmem:[#allocation3 + $0xc0] sm:$0xff] %vm318_vm0, %v711_v19 }
 0x1a5   : > { %v680_v20 = vpop.trf.xlu0 }
 0x1a6   : > { %v712_v21 = vpop.trf.xlu1  ;;  %728 = vst.msk [vmem:[#allocation3 + $0x48] sm:$0xff] %vm318_vm0, %v680_v20 }
 0x1a7   : > { %744 = vst.msk [vmem:[#allocation3 + $0xc8] sm:$0xff] %vm318_vm0, %v712_v21 }
 0x1a9   : > { %v681_v22 = vpop.trf.xlu0 }
 0x1aa   : > { %v713_v23 = vpop.trf.xlu1  ;;  %729 = vst.msk [vmem:[#allocation3 + $0x50] sm:$0xff] %vm318_vm0, %v681_v22 }
 0x1ab   : > { %745 = vst.msk [vmem:[#allocation3 + $0xd0] sm:$0xff] %vm318_vm0, %v713_v23 }
 0x1ad   : > { %v682_v24 = vpop.trf.xlu0 }
 0x1ae   : > { %v714_v25 = vpop.trf.xlu1  ;;  %730 = vst.msk [vmem:[#allocation3 + $0x58] sm:$0xff] %vm318_vm0, %v682_v24 }
 0x1af   : > { %746 = vst.msk [vmem:[#allocation3 + $0xd8] sm:$0xff] %vm318_vm0, %v714_v25 }
 0x1b1   : > { %v683_v26 = vpop.trf.xlu0 }
 0x1b2   : > { %v715_v27 = vpop.trf.xlu1  ;;  %731 = vst.msk [vmem:[#allocation3 + $0x60] sm:$0xff] %vm318_vm0, %v683_v26 }
 0x1b3   : > { %747 = vst.msk [vmem:[#allocation3 + $0xe0] sm:$0xff] %vm318_vm0, %v715_v27 }
 0x1b5   : > { %v684_v28 = vpop.trf.xlu0 }
 0x1b6   : > { %v716_v29 = vpop.trf.xlu1  ;;  %732 = vst.msk [vmem:[#allocation3 + $0x68] sm:$0xff] %vm318_vm0, %v684_v28 }
 0x1b7   : > { %748 = vst.msk [vmem:[#allocation3 + $0xe8] sm:$0xff] %vm318_vm0, %v716_v29 }
 0x1b9   : > { %v685_v30 = vpop.trf.xlu0 }
 0x1ba   : > { %v717_v31 = vpop.trf.xlu1  ;;  %733 = vst.msk [vmem:[#allocation3 + $0x70] sm:$0xff] %vm318_vm0, %v685_v30 }
 0x1bb   : > { %749 = vst.msk [vmem:[#allocation3 + $0xf0] sm:$0xff] %vm318_vm0, %v717_v31 }
 0x1bd   : > { %v686_v32 = vpop.trf.xlu0 }
 0x1be   : > { %v718_v33 = vpop.trf.xlu1  ;;  %734 = vst.msk [vmem:[#allocation3 + $0x78] sm:$0xff] %vm318_vm0, %v686_v32 }
 0x1bf   : > { %750 = vst.msk [vmem:[#allocation3 + $0xf8] sm:$0xff] %vm318_vm0, %v718_v33 }
 0x1c0 PF: > { %s1796_s23 = sshll.u32 %s2275_s29, 7  ;;  %v761_v34 = vld [vmem:[#allocation2 + $0x8] sm:$0xff]  ;;  %v763_v35 = vld [vmem:[#allocation2 + $0x18] sm:$0xff]  ;;  %v760_v36 = vld [vmem:[#allocation2] sm:$0xff]  ;;  %v2296_v41 = vmov 0.0   ;;  %vm812_vm2 = vcmask 261120   ;;  %v770_v3 = vlaneseq }
 0x1c1   : > { %s752_s24 = sshra.s32 %s1796_s23, 7  ;;  %v1962_v37 = vpack.c.bf16 %v763_v35, %v761_v34  ;;  %v762_v38 = vld [vmem:[#allocation2 + $0x10] sm:$0xff]  ;;  %v765_v39 = vld [vmem:[#allocation2 + $0x28] sm:$0xff]  ;;  %v767_v40 = vld [vmem:[#allocation2 + $0x38] sm:$0xff]  ;;  %925 = vmatprep.mubr.f32.mxu0 %v2296_v41  ;;  %s1832_s11 = sshll.u32 (%p2394_p3), %s2279_s30, 3 }
 0x1c2   : > { %s1797_s0 = sshll.u32 %s752_s24, 3  ;;  %v1964_v42 = vpack.c.bf16 %v762_v38, %v760_v36  ;;  %v1966_v43 = vpack.c.bf16 %v767_v40, %v765_v39  ;;  %v764_v44 = vld [vmem:[#allocation2 + $0x20] sm:$0xff]  ;;  %v766_v45 = vld [vmem:[#allocation2 + $0x30] sm:$0xff]  ;;  %v771_v4 = vshrl.u32 %v770_v3, 7  ;;  %s1610_s19 = sadd.s32 (%p2394_p3), %s2275_s29, %s1832_s11 }
 0x1c3   : > { %s2522_s25 = scalar_lea.vmem %s2424_s14, %s1797_s0  ;;  %1963 = vmatprep.subr.bf16.mxu0 %v1962_v37  ;;  %v1968_v47 = vpack.c.bf16 %v766_v45, %v764_v44  ;;  %v768_v6 = vld [vmem:[#allocation4] sm:$0x3]  ;;  %s1551_s14 = sld [smem:[#allocation5]] }
 0x1c4   : > { %v756_v46 = vld [vmem:[%s2522_s25] sm:$0xff]  ;;  %1965 = vmatpush1.bf16.msra.mxu0 %v1964_v42  ;;  %v757_v48 = vld [vmem:[%s2522_s25 + $0x10] sm:$0xff]  ;;  %v772_v5 = vsub.s32 0, %v771_v4  ;;  %v776_v7 = vsub.s32 1, %v771_v4  ;;  %s1833_s22 = sshll.u32 (%p2394_p3), %s1610_s19, 3 }
 0x1c5   : > { %780 = vxpose.xlu0.b32.start [1/4] (short) %v756_v46, 128  ;;  %1967 = vmatprep.subr.bf16.mxu0 %v1966_v43  ;;  %v758_v49 = vld [vmem:[%s2522_s25 + $0x20] sm:$0xff]  ;;  %v759_v50 = vld [vmem:[%s2522_s25 + $0x30] sm:$0xff]  ;;  %s1612_s0 = scalar_lea.vmem (%p2394_p3), %s2954_s6, %s1833_s22 }
 0x1c6   : > { %v2559_v8 = vrot.slane %v768_v6, %v772_v5  ;;  %v2561_v9 = vrot.slane %v768_v6, %v776_v7 }
 0x1c8   : > { %1969 = vmatpush1.bf16.msra.mxu0 %v1968_v47 }
 0x1c9   : > { %781 = vxpose.xlu0.b32.cont [2/4] (short) %v757_v48, 128 }
 0x1cd   : > { %782 = vxpose.xlu0.b32.cont [3/4] (short) %v758_v49, 128 }
 0x1d1   : > { %783 = vxpose.xlu0.b32.end [4/4] (short) %v759_v50, 128 }
 0x245   : > { %v796_v51 = vpop.trf.xlu0 }
 0x246   : > { %1798 = vmatmul.mubr.msk.f32.vlgmr.msra.gmra.mrb[0].mxu0 %vm812_vm2, %v796_v51 }
 0x247   : > { %931 = vmatprep.mubr.f32.mxu0 %v2296_v41 }
 0x249   : > { %v797_v52 = vpop.trf.xlu0 }
 0x24a   : > { %1799 = vmatmul.mubr.msk.f32.gmra.mrb[2].mxu0 %vm812_vm2, %v797_v52 }
 0x24b   : > { %937 = vmatprep.mubr.f32.mxu0 %v2296_v41 }
 0x24d   : > { %v798_v53 = vpop.trf.xlu0 }
 0x24e   : > { %1800 = vmatmul.mubr.msk.f32.gmra.mrb[4].mxu0 %vm812_vm2, %v798_v53 }
 0x24f   : > { %943 = vmatprep.mubr.f32.mxu0 %v2296_v41 }
 0x251   : > { %v799_v54 = vpop.trf.xlu0 }
 0x252   : > { %1801 = vmatmul.mubr.msk.f32.gmra.mrb[6].mxu0 %vm812_vm2, %v799_v54 }
 0x253   : > { %949 = vmatprep.mubr.f32.mxu0 %v2296_v41 }
 0x255   : > { %v800_v55 = vpop.trf.xlu0 }
 0x256   : > { %1802 = vmatmul.mubr.msk.f32.gmra.mrb[8].mxu0 %vm812_vm2, %v800_v55 }
 0x257   : > { %955 = vmatprep.mubr.f32.mxu0 %v2296_v41 }
 0x259   : > { %v801_v56 = vpop.trf.xlu0 }
 0x25a   : > { %1803 = vmatmul.mubr.msk.f32.gmra.mrb[10].mxu0 %vm812_vm2, %v801_v56 }
 0x25b   : > { %961 = vmatprep.mubr.f32.mxu0 %v2296_v41 }
 0x25d   : > { %v802_v57 = vpop.trf.xlu0 }
 0x25e   : > { %1804 = vmatmul.mubr.msk.f32.gmra.mrb[12].mxu0 %vm812_vm2, %v802_v57 }
 0x25f   : > { %967 = vmatprep.mubr.f32.mxu0 %v2296_v41 }
 0x261   : > { %v803_v58 = vpop.trf.xlu0 }
 0x262   : > { %1805 = vmatmul.mubr.msk.f32.gmra.mrb[14].mxu0 %vm812_vm2, %v803_v58 }
 0x263   : > { %973 = vmatprep.mubr.f32.mxu0 %v2296_v41 }
 0x265   : > { %v804_v59 = vpop.trf.xlu0 }
 0x266   : > { %1806 = vmatmul.mubr.msk.f32.gmra.mrb[16].mxu0 %vm812_vm2, %v804_v59 }
 0x267   : > { %979 = vmatprep.mubr.f32.mxu0 %v2296_v41 }
 0x269   : > { %v805_v60 = vpop.trf.xlu0 }
 0x26a   : > { %1807 = vmatmul.mubr.msk.f32.gmra.mrb[18].mxu0 %vm812_vm2, %v805_v60 }
 0x26b   : > { %985 = vmatprep.mubr.f32.mxu0 %v2296_v41 }
 0x26d   : > { %v806_v61 = vpop.trf.xlu0 }
 0x26e   : > { %1808 = vmatmul.mubr.msk.f32.gmra.mrb[20].mxu0 %vm812_vm2, %v806_v61 }
 0x26f   : > { %991 = vmatprep.mubr.f32.mxu0 %v2296_v41 }
 0x271   : > { %v807_v62 = vpop.trf.xlu0 }
 0x272   : > { %1809 = vmatmul.mubr.msk.f32.gmra.mrb[22].mxu0 %vm812_vm2, %v807_v62 }
 0x273   : > { %997 = vmatprep.mubr.f32.mxu0 %v2296_v41 }
 0x275   : > { %v808_v63 = vpop.trf.xlu0 }
 0x276   : > { %1810 = vmatmul.mubr.msk.f32.gmra.mrb[24].mxu0 %vm812_vm2, %v808_v63 }
 0x277   : > { %1003 = vmatprep.mubr.f32.mxu0 %v2296_v41 }
 0x279   : > { %v809_v0 = vpop.trf.xlu0 }
 0x27a   : > { %1811 = vmatmul.mubr.msk.f32.gmra.mrb[26].mxu0 %vm812_vm2, %v809_v0 }
 0x27b   : > { %1009 = vmatprep.mubr.f32.mxu0 %v2296_v41 }
 0x27d   : > { %v810_v1 = vpop.trf.xlu0 }
 0x27e   : > { %1812 = vmatmul.mubr.msk.f32.gmra.mrb[28].mxu0 %vm812_vm2, %v810_v1 }
 0x27f   : > { %1015 = vmatprep.mubr.f32.mxu0 %v2296_v41 }
 0x281   : > { %v811_v2 = vpop.trf.xlu0 }
 0x282   : > { %1813 = vmatmul.mubr.msk.f32.gmra.mrb[30].mxu0 %vm812_vm2, %v811_v2 }
 0x319   : > { %v927_v10 = vpop.f32.mrb[0].mxu0 }
 0x31a   : > { %v2564_v11 = vadd.f32 %v927_v10, %v2559_v8  ;;  %v929_v12 = vpop.f32.mrb[1].mxu0 }
 0x31b   : > { %v2567_v13 = vadd.f32 %v929_v12, %v2561_v9 }
 0x31d   : > { %v933_v14 = vpop.f32.mrb[2].mxu0  ;;  %v1022_v15 = vmax.f32 %v2564_v11, %v2567_v13 }
 0x31e   : > { %v2572_v16 = vadd.f32 %v933_v14, %v2559_v8  ;;  %v935_v17 = vpop.f32.mrb[3].mxu0 }
 0x31f   : > { %v2575_v18 = vadd.f32 %v935_v17, %v2561_v9  ;;  %1023 = vmax.xlane.f32.xlu0 %v1022_v15 }
 0x321   : > { %v939_v19 = vpop.f32.mrb[4].mxu0  ;;  %v1025_v20 = vmax.f32 %v2572_v16, %v2575_v18 }
 0x322   : > { %v2580_v21 = vadd.f32 %v939_v19, %v2559_v8  ;;  %v941_v22 = vpop.f32.mrb[5].mxu0 }
 0x323   : > { %v2583_v23 = vadd.f32 %v941_v22, %v2561_v9  ;;  %1026 = vmax.xlane.f32.xlu1 %v1025_v20 }
 0x325   : > { %v945_v24 = vpop.f32.mrb[6].mxu0  ;;  %v1028_v25 = vmax.f32 %v2580_v21, %v2583_v23 }
 0x326   : > { %v2588_v26 = vadd.f32 %v945_v24, %v2559_v8  ;;  %v947_v27 = vpop.f32.mrb[7].mxu0 }
 0x327   : > { %v2591_v28 = vadd.f32 %v947_v27, %v2561_v9  ;;  %1029 = vmax.xlane.f32.xlu1 %v1028_v25 }
 0x329   : > { %v951_v29 = vpop.f32.mrb[8].mxu0  ;;  %v1031_v30 = vmax.f32 %v2588_v26, %v2591_v28 }
 0x32a   : > { %v2596_v31 = vadd.f32 %v951_v29, %v2559_v8  ;;  %v953_v32 = vpop.f32.mrb[9].mxu0 }
 0x32b   : > { %v2599_v33 = vadd.f32 %v953_v32, %v2561_v9  ;;  %1032 = vmax.xlane.f32.xlu1 %v1031_v30 }
 0x32d   : > { %v957_v34 = vpop.f32.mrb[10].mxu0  ;;  %v1034_v35 = vmax.f32 %v2596_v31, %v2599_v33 }
 0x32e   : > { %v2604_v36 = vadd.f32 %v957_v34, %v2559_v8  ;;  %v959_v37 = vpop.f32.mrb[11].mxu0 }
 0x32f   : > { %v2607_v38 = vadd.f32 %v959_v37, %v2561_v9  ;;  %1035 = vmax.xlane.f32.xlu1 %v1034_v35 }
 0x331   : > { %v963_v39 = vpop.f32.mrb[12].mxu0  ;;  %v1037_v40 = vmax.f32 %v2604_v36, %v2607_v38 }
 0x332   : > { %v2612_v41 = vadd.f32 %v963_v39, %v2559_v8  ;;  %v965_v42 = vpop.f32.mrb[13].mxu0 }
 0x333   : > { %v2615_v43 = vadd.f32 %v965_v42, %v2561_v9  ;;  %1038 = vmax.xlane.f32.xlu1 %v1037_v40  ;;  %v1390_v40 = vld [vmem:[#allocation3 + $0x80] sm:$0xff]  ;;  %v1391_v42 = vld [vmem:[#allocation3 + $0x88] sm:$0xff] }
 0x335   : > { %v969_v44 = vpop.f32.mrb[14].mxu0  ;;  %v1040_v45 = vmax.f32 %v2612_v41, %v2615_v43 }
 0x336   : > { %v2620_v46 = vadd.f32 %v969_v44, %v2559_v8  ;;  %v971_v47 = vpop.f32.mrb[15].mxu0  ;;  %v1374_v44 = vld [vmem:[#allocation3] sm:$0xff] }
 0x337   : > { %v2623_v48 = vadd.f32 %v971_v47, %v2561_v9  ;;  %1041 = vmax.xlane.f32.xlu1 %v1040_v45  ;;  %v1970_v45 = vpack.c.bf16 %v1391_v42, %v1390_v40  ;;  %v1375_v47 = vld [vmem:[#allocation3 + $0x8] sm:$0xff]  ;;  %v1384_v42 = vld [vmem:[#allocation3 + $0x50] sm:$0xff] }
 0x339   : > { %v975_v49 = vpop.f32.mrb[16].mxu0  ;;  %v1043_v50 = vmax.f32 %v2620_v46, %v2623_v48  ;;  %1971 = vmatprep.subr.bf16.mxu0 %v1970_v45  ;;  %2002 = vmatprep.subr.bf16.mxu1 %v1970_v45  ;;  %v1402_v45 = vld [vmem:[#allocation3 + $0xe0] sm:$0xff] }
 0x33a   : > { %v2628_v51 = vadd.f32 %v975_v49, %v2559_v8  ;;  %v977_v52 = vpop.f32.mrb[17].mxu0  ;;  %v1392_v49 = vld [vmem:[#allocation3 + $0x90] sm:$0xff] }
 0x33b   : > { %v2631_v53 = vadd.f32 %v977_v52, %v2561_v9  ;;  %1044 = vmax.xlane.f32.xlu1 %v1043_v50  ;;  %v1393_v50 = vld [vmem:[#allocation3 + $0x98] sm:$0xff]  ;;  %v1972_v52 = vpack.c.bf16 %v1375_v47, %v1374_v44  ;;  %v1403_v47 = vld [vmem:[#allocation3 + $0xe8] sm:$0xff] }
 0x33c   : > { %v1385_v44 = vld [vmem:[#allocation3 + $0x58] sm:$0xff] }
 0x33d   : > { %v981_v54 = vpop.f32.mrb[18].mxu0  ;;  %v1046_v55 = vmax.f32 %v2628_v51, %v2631_v53  ;;  %1973 = vmatpush3.bf16.msra.mxu0 %v1972_v52  ;;  %2010 = vmatpush3.bf16.msra.mxu1 %v1972_v52  ;;  %v1386_v52 = vld [vmem:[#allocation3 + $0x60] sm:$0xff] }
 0x33e   : > { %v2636_v56 = vadd.f32 %v981_v54, %v2559_v8  ;;  %v983_v57 = vpop.f32.mrb[19].mxu0  ;;  %v1974_v54 = vpack.c.bf16 %v1393_v50, %v1392_v49  ;;  %v1992_v49 = vpack.c.bf16 %v1385_v44, %v1384_v42  ;;  %v1994_v50 = vpack.c.bf16 %v1403_v47, %v1402_v45 }
 0x33f   : > { %v2639_v58 = vadd.f32 %v983_v57, %v2561_v9  ;;  %1047 = vmax.xlane.f32.xlu1 %v1046_v55  ;;  %v1377_v55 = vld [vmem:[#allocation3 + $0x18] sm:$0xff]  ;;  %v1394_v57 = vld [vmem:[#allocation3 + $0xa0] sm:$0xff] }
 0x340   : > { %1975 = vmatprep.subr.bf16.mxu0 %v1974_v54  ;;  %2003 = vmatprep.subr.bf16.mxu1 %v1974_v54  ;;  %v1387_v54 = vld [vmem:[#allocation3 + $0x68] sm:$0xff] }
 0x341   : > { %v987_v59 = vpop.f32.mrb[20].mxu0  ;;  %v1049_v60 = vmax.f32 %v2636_v56, %v2639_v58 }
 0x342   : > { %v2644_v61 = vadd.f32 %v987_v59, %v2559_v8  ;;  %v989_v62 = vpop.f32.mrb[21].mxu0 }
 0x343   : > { %v2647_v63 = vadd.f32 %v989_v62, %v2561_v9  ;;  %1050 = vmax.xlane.f32.xlu1 %v1049_v60  ;;  %v1378_v62 = vld [vmem:[#allocation3 + $0x20] sm:$0xff] }
 0x345   : > { %v993_v0 = vpop.f32.mrb[22].mxu0  ;;  %v1052_v1 = vmax.f32 %v2644_v61, %v2647_v63 }
 0x346   : > { %v2652_v2 = vadd.f32 %v993_v0, %v2559_v8  ;;  %v995_v3 = vpop.f32.mrb[23].mxu0  ;;  %v1379_v0 = vld [vmem:[#allocation3 + $0x28] sm:$0xff] }
 0x347   : > { %v2655_v4 = vadd.f32 %v995_v3, %v2561_v9  ;;  %1053 = vmax.xlane.f32.xlu1 %v1052_v1  ;;  %v1396_v1 = vld [vmem:[#allocation3 + $0xb0] sm:$0xff]  ;;  %v1397_v3 = vld [vmem:[#allocation3 + $0xb8] sm:$0xff] }
 0x349   : > { %v999_v5 = vpop.f32.mrb[24].mxu0  ;;  %v1055_v6 = vmax.f32 %v2652_v2, %v2655_v4 }
 0x34a   : > { %v2660_v7 = vadd.f32 %v999_v5, %v2559_v8  ;;  %v1001_v10 = vpop.f32.mrb[25].mxu0  ;;  %v1980_v5 = vpack.c.bf16 %v1379_v0, %v1378_v62 }
 0x34b   : > { %v2663_v12 = vadd.f32 %v1001_v10, %v2561_v9  ;;  %1056 = vmax.xlane.f32.xlu1 %v1055_v6  ;;  %v1982_v6 = vpack.c.bf16 %v1397_v3, %v1396_v1  ;;  %v1380_v10 = vld [vmem:[#allocation3 + $0x30] sm:$0xff] }
 0x34d   : > { %v1005_v14 = vpop.f32.mrb[26].mxu0  ;;  %v1058_v15 = vmax.f32 %v2660_v7, %v2663_v12 }
 0x34e   : > { %v2668_v17 = vadd.f32 %v1005_v14, %v2559_v8  ;;  %v1007_v19 = vpop.f32.mrb[27].mxu0  ;;  %v1381_v14 = vld [vmem:[#allocation3 + $0x38] sm:$0xff] }
 0x34f   : > { %v2671_v20 = vadd.f32 %v1007_v19, %v2561_v9  ;;  %1059 = vmax.xlane.f32.xlu1 %v1058_v15  ;;  %v1398_v15 = vld [vmem:[#allocation3 + $0xc0] sm:$0xff]  ;;  %v1399_v19 = vld [vmem:[#allocation3 + $0xc8] sm:$0xff] }
 0x351   : > { %v1011_v22 = vpop.f32.mrb[28].mxu0  ;;  %v1061_v24 = vmax.f32 %v2668_v17, %v2671_v20 }
 0x352   : > { %v2676_v25 = vadd.f32 %v1011_v22, %v2559_v8  ;;  %v1013_v27 = vpop.f32.mrb[29].mxu0  ;;  %v1984_v22 = vpack.c.bf16 %v1381_v14, %v1380_v10 }
 0x353   : > { %v2679_v29 = vadd.f32 %v1013_v27, %v2561_v9  ;;  %1062 = vmax.xlane.f32.xlu1 %v1061_v24  ;;  %v1986_v24 = vpack.c.bf16 %v1399_v19, %v1398_v15  ;;  %v1382_v27 = vld [vmem:[#allocation3 + $0x40] sm:$0xff] }
 0x355   : > { %v1017_v30 = vpop.f32.mrb[30].mxu0  ;;  %v1064_v32 = vmax.f32 %v2676_v25, %v2679_v29 }
 0x356   : > { %v2684_v34 = vadd.f32 %v1017_v30, %v2559_v8  ;;  %v1019_v35 = vpop.f32.mrb[31].mxu0  ;;  %v1376_v8 = vld [vmem:[#allocation3 + $0x10] sm:$0xff]  ;;  %v1383_v30 = vld [vmem:[#allocation3 + $0x48] sm:$0xff] }
 0x357   : > { %v2687_v37 = vadd.f32 %v1019_v35, %v2561_v9  ;;  %1065 = vmax.xlane.f32.xlu1 %v1064_v32  ;;  %v1395_v9 = vld [vmem:[#allocation3 + $0xa8] sm:$0xff]  ;;  %v1976_v59 = vpack.c.bf16 %v1377_v55, %v1376_v8  ;;  %v1400_v32 = vld [vmem:[#allocation3 + $0xd0] sm:$0xff]  ;;  %v1401_v35 = vld [vmem:[#allocation3 + $0xd8] sm:$0xff]  ;;  %v1996_v8 = vpack.c.bf16 %v1387_v54, %v1386_v52 }
 0x358   : > { %v1978_v60 = vpack.c.bf16 %v1395_v9, %v1394_v57  ;;  %v1990_v40 = vpack.c.bf16 %v1401_v35, %v1400_v32 }
 0x359   : > { %v1067_v39 = vmax.f32 %v2684_v34, %v2687_v37  ;;  %1977 = vmatpush3.bf16.msra.mxu0 %v1976_v59  ;;  %2011 = vmatpush3.bf16.msra.mxu1 %v1976_v59 }
 0x35a   : > { %1979 = vmatprep.subr.bf16.mxu0 %v1978_v60  ;;  %2004 = vmatprep.subr.bf16.mxu1 %v1978_v60 }
 0x35b   : > { %1068 = vmax.xlane.f32.xlu1 %v1067_v39  ;;  %v1988_v39 = vpack.c.bf16 %v1383_v30, %v1382_v27 }
 0x35d   : > { %1981 = vmatpush3.bf16.msra.mxu0 %v1980_v5  ;;  %2012 = vmatpush3.bf16.msra.mxu1 %v1980_v5 }
 0x35e   : > { %1983 = vmatprep.subr.bf16.mxu0 %v1982_v6  ;;  %2005 = vmatprep.subr.bf16.mxu1 %v1982_v6 }
 0x361   : > { %1985 = vmatpush3.bf16.msra.mxu0 %v1984_v22  ;;  %2013 = vmatpush3.bf16.msra.mxu1 %v1984_v22 }
 0x362   : > { %1987 = vmatprep.subr.bf16.mxu0 %v1986_v24  ;;  %2006 = vmatprep.subr.bf16.mxu1 %v1986_v24 }
 0x365   : > { %1989 = vmatpush3.bf16.msra.mxu0 %v1988_v39  ;;  %2014 = vmatpush3.bf16.msra.mxu1 %v1988_v39 }
 0x366   : > { %1991 = vmatprep.subr.bf16.mxu0 %v1990_v40  ;;  %2007 = vmatprep.subr.bf16.mxu1 %v1990_v40 }
 0x369   : > { %1993 = vmatpush3.bf16.msra.mxu0 %v1992_v49  ;;  %2015 = vmatpush3.bf16.msra.mxu1 %v1992_v49 }
 0x36a   : > { %1995 = vmatprep.subr.bf16.mxu0 %v1994_v50  ;;  %2008 = vmatprep.subr.bf16.mxu1 %v1994_v50 }
 0x36d   : > { %1997 = vmatpush3.bf16.msra.mxu0 %v1996_v8  ;;  %2016 = vmatpush3.bf16.msra.mxu1 %v1996_v8 }
 0x3ac   : > { %v1024_v55 = vpop.xlane.xlu0 %1023 }
 0x3ad   : > { %v1070_v57 = vsub.f32 %v2564_v11, %v1024_v55  ;;  %v1071_v9 = vsub.f32 %v2567_v13, %v1024_v55 }
 0x3af   : > { %v1102_v59 = vmul.f32 1.442695, %v1070_v57  ;;  %v1104_v60 = vmul.f32 1.442695, %v1071_v9 }
 0x3b0   : > { %v1027_v62 = vpop.xlane.xlu1 %1026 }
 0x3b1   : > { %2097 = vpow2.f32 %v1102_v59  ;;  %v1072_v0 = vsub.f32 %v2572_v16, %v1027_v62  ;;  %v1073_v1 = vsub.f32 %v2575_v18, %v1027_v62 }
 0x3b2   : > { %2099 = vpow2.f32 %v1104_v60 }
 0x3b3   : > { %v1106_v3 = vmul.f32 1.442695, %v1072_v0  ;;  %v1108_v5 = vmul.f32 1.442695, %v1073_v1 }
 0x3b4   : > { %v1030_v6 = vpop.xlane.xlu1 %1029 }
 0x3b5   : > { %2101 = vpow2.f32 %v1106_v3  ;;  %v1074_v10 = vsub.f32 %v2580_v21, %v1030_v6  ;;  %v1075_v14 = vsub.f32 %v2583_v23, %v1030_v6 }
 0x3b6   : > { %2103 = vpow2.f32 %v1108_v5 }
 0x3b7   : > { %v1110_v11 = vmul.f32 1.442695, %v1074_v10  ;;  %v1112_v13 = vmul.f32 1.442695, %v1075_v14 }
 0x3b8   : > { %v1033_v15 = vpop.xlane.xlu1 %1032 }
 0x3b9   : > { %2105 = vpow2.f32 %v1110_v11  ;;  %v1076_v19 = vsub.f32 %v2588_v26, %v1033_v15  ;;  %v1077_v16 = vsub.f32 %v2591_v28, %v1033_v15 }
 0x3ba   : > { %2107 = vpow2.f32 %v1112_v13 }
 0x3bb   : > { %v2699_v18 = vpop.eup %2097  ;;  %v1114_v22 = vmul.f32 1.442695, %v1076_v19  ;;  %v1116_v24 = vmul.f32 1.442695, %v1077_v16  ;;  %v1405_v16 = vld [vmem:[#allocation3 + $0xf8] sm:$0xff] }
 0x3bc   : > { %v2701_v27 = vpop.eup %2099  ;;  %v1036_v30 = vpop.xlane.xlu1 %1035 }
 0x3bd   : > { %2109 = vpow2.f32 %v1114_v22  ;;  %v1078_v21 = vsub.f32 %v2596_v31, %v1036_v30  ;;  %v1079_v23 = vsub.f32 %v2599_v33, %v1036_v30  ;;  %v1166_v32 = vadd.f32 %v2701_v27, %v2699_v18  ;;  %v1388_v22 = vld [vmem:[#allocation3 + $0x70] sm:$0xff]  ;;  %v1389_v30 = vld [vmem:[#allocation3 + $0x78] sm:$0xff] }
 0x3be   : > { %2111 = vpow2.f32 %v1116_v24 }
 0x3bf   : > { %v2707_v26 = vpop.eup %2101  ;;  %v1118_v28 = vmul.f32 1.442695, %v1078_v21  ;;  %v1120_v35 = vmul.f32 1.442695, %v1079_v23  ;;  %1167 = vadd.xlane.f32.xlu1 %v1166_v32 }
 0x3c0   : > { %v2709_v39 = vpop.eup %2103  ;;  %v1039_v40 = vpop.xlane.xlu1 %1038 }
 0x3c1   : > { %2113 = vpow2.f32 %v1118_v28  ;;  %v1080_v42 = vsub.f32 %v2604_v36, %v1039_v40  ;;  %v1081_v44 = vsub.f32 %v2607_v38, %v1039_v40  ;;  %v1169_v31 = vadd.f32 %v2709_v39, %v2707_v26 }
 0x3c2   : > { %2115 = vpow2.f32 %v1120_v35  ;;  %v2000_v28 = vpack.c.bf16 %v1389_v30, %v1388_v22 }
 0x3c3   : > { %v2715_v33 = vpop.eup %2105  ;;  %v1122_v45 = vmul.f32 1.442695, %v1080_v42  ;;  %v1124_v47 = vmul.f32 1.442695, %v1081_v44  ;;  %1170 = vadd.xlane.f32.xlu1 %v1169_v31 }
 0x3c4   : > { %v2717_v49 = vpop.eup %2107  ;;  %v1042_v50 = vpop.xlane.xlu1 %1041 }
 0x3c5   : > { %2117 = vpow2.f32 %v1122_v45  ;;  %v1082_v52 = vsub.f32 %v2612_v41, %v1042_v50  ;;  %v1083_v54 = vsub.f32 %v2615_v43, %v1042_v50  ;;  %v1172_v36 = vadd.f32 %v2717_v49, %v2715_v33 }
 0x3c6   : > { %2119 = vpow2.f32 %v1124_v47 }
 0x3c7   : > { %v2723_v38 = vpop.eup %2109  ;;  %v1126_v8 = vmul.f32 1.442695, %v1082_v52  ;;  %v1128_v55 = vmul.f32 1.442695, %v1083_v54  ;;  %1173 = vadd.xlane.f32.xlu1 %v1172_v36 }
 0x3c8   : > { %v2725_v57 = vpop.eup %2111  ;;  %v1045_v9 = vpop.xlane.xlu1 %1044 }
 0x3c9   : > { %2121 = vpow2.f32 %v1126_v8  ;;  %v1084_v59 = vsub.f32 %v2620_v46, %v1045_v9  ;;  %v1085_v60 = vsub.f32 %v2623_v48, %v1045_v9  ;;  %v1175_v41 = vadd.f32 %v2725_v57, %v2723_v38 }
 0x3ca   : > { %2123 = vpow2.f32 %v1128_v55 }
 0x3cb   : > { %v2731_v43 = vpop.eup %2113  ;;  %v1130_v62 = vmul.f32 1.442695, %v1084_v59  ;;  %v1132_v0 = vmul.f32 1.442695, %v1085_v60  ;;  %1176 = vadd.xlane.f32.xlu1 %v1175_v41 }
 0x3cc   : > { %v2733_v1 = vpop.eup %2115  ;;  %v1048_v3 = vpop.xlane.xlu1 %1047 }
 0x3cd   : > { %2125 = vpow2.f32 %v1130_v62  ;;  %v1086_v5 = vsub.f32 %v2628_v51, %v1048_v3  ;;  %v1087_v6 = vsub.f32 %v2631_v53, %v1048_v3  ;;  %v1178_v46 = vadd.f32 %v2733_v1, %v2731_v43  ;;  %v1404_v53 = vld [vmem:[#allocation3 + $0xf0] sm:$0xff] }
 0x3ce   : > { %2127 = vpow2.f32 %v1132_v0  ;;  %v1998_v24 = vpack.c.bf16 %v1405_v16, %v1404_v53 }
 0x3cf   : > { %v2739_v48 = vpop.eup %2117  ;;  %v1134_v10 = vmul.f32 1.442695, %v1086_v5  ;;  %v1136_v14 = vmul.f32 1.442695, %v1087_v6  ;;  %1179 = vadd.xlane.f32.xlu1 %v1178_v46 }
 0x3d0   : > { %v2741_v11 = vpop.eup %2119  ;;  %v1051_v13 = vpop.xlane.xlu1 %1050  ;;  %1999 = vmatprep.subr.bf16.mxu0 %v1998_v24  ;;  %2009 = vmatprep.subr.bf16.mxu1 %v1998_v24 }
 0x3d1   : > { %2129 = vpow2.f32 %v1134_v10  ;;  %v1088_v15 = vsub.f32 %v2636_v56, %v1051_v13  ;;  %v1089_v19 = vsub.f32 %v2639_v58, %v1051_v13  ;;  %v1181_v51 = vadd.f32 %v2741_v11, %v2739_v48  ;;  %2001 = vmatpush3.bf16.msra.mxu0 %v2000_v28  ;;  %2017 = vmatpush3.bf16.msra.mxu1 %v2000_v28 }
 0x3d2   : > { %2131 = vpow2.f32 %v1136_v14 }
 0x3d3   : > { %v2747_v21 = vpop.eup %2121  ;;  %v1138_v23 = vmul.f32 1.442695, %v1088_v15  ;;  %v1140_v32 = vmul.f32 1.442695, %v1089_v19  ;;  %1182 = vadd.xlane.f32.xlu1 %v1181_v51 }
 0x3d4   : > { %v2749_v35 = vpop.eup %2123  ;;  %v1054_v56 = vpop.xlane.xlu1 %1053 }
 0x3d5   : > { %2133 = vpow2.f32 %v1138_v23  ;;  %v1090_v58 = vsub.f32 %v2644_v61, %v1054_v56  ;;  %v1091_v40 = vsub.f32 %v2647_v63, %v1054_v56  ;;  %v1184_v42 = vadd.f32 %v2749_v35, %v2747_v21 }
 0x3d6   : > { %2135 = vpow2.f32 %v1140_v32 }
 0x3d7   : > { %v2755_v44 = vpop.eup %2125  ;;  %v1142_v31 = vmul.f32 1.442695, %v1090_v58  ;;  %v1144_v45 = vmul.f32 1.442695, %v1091_v40  ;;  %1185 = vadd.xlane.f32.xlu1 %v1184_v42 }
 0x3d8   : > { %v2757_v47 = vpop.eup %2127  ;;  %v1057_v50 = vpop.xlane.xlu1 %1056 }
 0x3d9   : > { %2137 = vpow2.f32 %v1142_v31  ;;  %v1092_v52 = vsub.f32 %v2652_v2, %v1057_v50  ;;  %v1093_v61 = vsub.f32 %v2655_v4, %v1057_v50  ;;  %v1187_v63 = vadd.f32 %v2757_v47, %v2755_v44 }
 0x3da   : > { %2139 = vpow2.f32 %v1144_v45 }
 0x3db   : > { %v2763_v54 = vpop.eup %2129  ;;  %v1146_v36 = vmul.f32 1.442695, %v1092_v52  ;;  %v1148_v8 = vmul.f32 1.442695, %v1093_v61  ;;  %1188 = vadd.xlane.f32.xlu1 %v1187_v63 }
 0x3dc   : > { %v2765_v55 = vpop.eup %2131  ;;  %v1060_v9 = vpop.xlane.xlu1 %1059 }
 0x3dd   : > { %2141 = vpow2.f32 %v1146_v36  ;;  %v1094_v59 = vsub.f32 %v2660_v7, %v1060_v9  ;;  %v1095_v60 = vsub.f32 %v2663_v12, %v1060_v9  ;;  %v1190_v2 = vadd.f32 %v2765_v55, %v2763_v54 }
 0x3de   : > { %2143 = vpow2.f32 %v1148_v8 }
 0x3df   : > { %v2771_v4 = vpop.eup %2133  ;;  %v1150_v41 = vmul.f32 1.442695, %v1094_v59  ;;  %v1152_v62 = vmul.f32 1.442695, %v1095_v60  ;;  %1191 = vadd.xlane.f32.xlu1 %v1190_v2 }
 0x3e0   : > { %v2773_v0 = vpop.eup %2135  ;;  %v1063_v3 = vpop.xlane.xlu1 %1062 }
 0x3e1   : > { %2145 = vpow2.f32 %v1150_v41  ;;  %v1096_v5 = vsub.f32 %v2668_v17, %v1063_v3  ;;  %v1097_v6 = vsub.f32 %v2671_v20, %v1063_v3  ;;  %v1193_v7 = vadd.f32 %v2773_v0, %v2771_v4 }
 0x3e2   : > { %2147 = vpow2.f32 %v1152_v62 }
 0x3e3   : > { %v2779_v12 = vpop.eup %2137  ;;  %v1154_v46 = vmul.f32 1.442695, %v1096_v5  ;;  %v1156_v10 = vmul.f32 1.442695, %v1097_v6  ;;  %1194 = vadd.xlane.f32.xlu1 %v1193_v7 }
 0x3e4   : > { %v2781_v14 = vpop.eup %2139  ;;  %v1066_v13 = vpop.xlane.xlu1 %1065 }
 0x3e5   : > { %2149 = vpow2.f32 %v1154_v46  ;;  %v1098_v15 = vsub.f32 %v2676_v25, %v1066_v13  ;;  %v1099_v19 = vsub.f32 %v2679_v29, %v1066_v13  ;;  %v1196_v17 = vadd.f32 %v2781_v14, %v2779_v12 }
 0x3e6   : > { %2151 = vpow2.f32 %v1156_v10 }
 0x3e7   : > { %v2787_v20 = vpop.eup %2141  ;;  %v1158_v51 = vmul.f32 1.442695, %v1098_v15  ;;  %v1160_v53 = vmul.f32 1.442695, %v1099_v19  ;;  %1197 = vadd.xlane.f32.xlu1 %v1196_v17 }
 0x3e8   : > { %v2789_v16 = vpop.eup %2143  ;;  %v1069_v22 = vpop.xlane.xlu1 %1068 }
 0x3e9   : > { %2153 = vpow2.f32 %v1158_v51  ;;  %v1100_v24 = vsub.f32 %v2684_v34, %v1069_v22  ;;  %v1101_v30 = vsub.f32 %v2687_v37, %v1069_v22  ;;  %v1199_v25 = vadd.f32 %v2789_v16, %v2787_v20 }
 0x3ea   : > { %2155 = vpow2.f32 %v1160_v53 }
 0x3eb   : > { %v2795_v29 = vpop.eup %2145  ;;  %v1162_v23 = vmul.f32 1.442695, %v1100_v24  ;;  %v1164_v32 = vmul.f32 1.442695, %v1101_v30  ;;  %1200 = vadd.xlane.f32.xlu1 %v1199_v25 }
 0x3ec   : > { %v2797_v28 = vpop.eup %2147 }
 0x3ed   : > { %2157 = vpow2.f32 %v1162_v23  ;;  %v1202_v56 = vadd.f32 %v2797_v28, %v2795_v29 }
 0x3ee   : > { %2159 = vpow2.f32 %v1164_v32 }
 0x3ef   : > { %v2801_v58 = vpop.eup %2149  ;;  %1203 = vadd.xlane.f32.xlu1 %v1202_v56 }
 0x3f0   : > { %v2803_v34 = vpop.eup %2151 }
 0x3f1   : > { %v1205_v37 = vadd.f32 %v2803_v34, %v2801_v58 }
 0x3f3   : > { %v2807_v40 = vpop.eup %2153  ;;  %1206 = vadd.xlane.f32.xlu0 %v1205_v37 }
 0x3f4   : > { %v2809_v42 = vpop.eup %2155 }
 0x3f5   : > { %v1208_v31 = vadd.f32 %v2809_v42, %v2807_v40 }
 0x3f7   : > { %v2813_v45 = vpop.eup %2157  ;;  %1209 = vadd.xlane.f32.xlu1 %v1208_v31 }
 0x3f8   : > { %v2815_v50 = vpop.eup %2159 }
 0x3f9   : > { %v1211_v52 = vadd.f32 %v2815_v50, %v2813_v45 }
 0x3fb   : > { %1212 = vadd.xlane.f32.xlu0 %v1211_v52 }
 0x44c   : > { %v1168_v61 = vpop.xlane.xlu1 %1167 }
 0x44d   : > { %2161 = vrcp.f32 %v1168_v61 }
 0x450   : > { %v1171_v63 = vpop.xlane.xlu1 %1170 }
 0x451   : > { %2163 = vrcp.f32 %v1171_v63 }
 0x454   : > { %v1174_v36 = vpop.xlane.xlu1 %1173 }
 0x455   : > { %2165 = vrcp.f32 %v1174_v36 }
 0x457   : > { %v2162_v8 = vpop.eup %2161 }
 0x458   : > { %v1177_v9 = vpop.xlane.xlu1 %1176  ;;  %v1230_v59 = vmul.f32 %v2162_v8, %v2699_v18  ;;  %v1231_v60 = vmul.f32 %v2162_v8, %v2701_v27 }
 0x459   : > { %2167 = vrcp.f32 %v1177_v9 }
 0x45a   : > { %v1841_v2 = vpack.c.bf16 %v1231_v60, %v1230_v59  ;;  %1470 = vmatprep.mubr.f32.mxu0 %v1231_v60 }
 0x45b   : > { %v2164_v41 = vpop.eup %2163  ;;  %1471 = vmatmul.mubr.f32.vlgmr.msra.gmra.mrb[32].mxu0 %v1230_v59 }
 0x45c   : > { %1358 = vst [vmem:[%s2428_s18] sm:$0xff] %v1841_v2  ;;  %v1180_v62 = vpop.xlane.xlu1 %1179  ;;  %v1233_v3 = vmul.f32 %v2164_v41, %v2709_v39  ;;  %v1232_v5 = vmul.f32 %v2164_v41, %v2707_v26 }
 0x45d   : > { %2169 = vrcp.f32 %v1180_v62 }
 0x45e   : > { %1475 = vmatprep.mubr.f32.mxu0 %v1233_v3  ;;  %v1842_v6 = vpack.c.bf16 %v1233_v3, %v1232_v5 }
 0x45f   : > { %v2166_v7 = vpop.eup %2165  ;;  %1476 = vmatmul.mubr.f32.gmra.mrb[34].mxu0 %v1232_v5 }
 0x460   : > { %1359 = vst [vmem:[%s2428_s18 + $0x8] sm:$0xff] %v1842_v6  ;;  %v1183_v18 = vpop.xlane.xlu1 %1182  ;;  %v1235_v27 = vmul.f32 %v2166_v7, %v2717_v49  ;;  %v1234_v46 = vmul.f32 %v2166_v7, %v2715_v33 }
 0x461   : > { %2171 = vrcp.f32 %v1183_v18 }
 0x462   : > { %1480 = vmatprep.mubr.f32.mxu0 %v1235_v27  ;;  %v1843_v10 = vpack.c.bf16 %v1235_v27, %v1234_v46 }
 0x463   : > { %v2168_v13 = vpop.eup %2167  ;;  %1481 = vmatmul.mubr.f32.gmra.mrb[36].mxu0 %v1234_v46 }
 0x464   : > { %1360 = vst [vmem:[%s2428_s18 + $0x10] sm:$0xff] %v1843_v10  ;;  %v1186_v39 = vpop.xlane.xlu1 %1185  ;;  %v1236_v26 = vmul.f32 %v2168_v13, %v2723_v38  ;;  %v1237_v15 = vmul.f32 %v2168_v13, %v2725_v57 }
 0x465   : > { %2173 = vrcp.f32 %v1186_v39 }
 0x466   : > { %v1844_v19 = vpack.c.bf16 %v1237_v15, %v1236_v26  ;;  %1485 = vmatprep.mubr.f32.mxu1 %v1237_v15 }
 0x467   : > { %v2170_v17 = vpop.eup %2169  ;;  %1486 = vmatmul.mubr.f32.vlgmr.msra.gmra.mrb[0].mxu1 %v1236_v26 }
 0x468   : > { %1361 = vst [vmem:[%s2428_s18 + $0x18] sm:$0xff] %v1844_v19  ;;  %v1189_v49 = vpop.xlane.xlu1 %1188  ;;  %v1239_v33 = vmul.f32 %v2170_v17, %v2733_v1  ;;  %v1238_v51 = vmul.f32 %v2170_v17, %v2731_v43 }
 0x469   : > { %2175 = vrcp.f32 %v1189_v49 }
 0x46a   : > { %1490 = vmatprep.mubr.f32.mxu1 %v1239_v33  ;;  %v1845_v53 = vpack.c.bf16 %v1239_v33, %v1238_v51 }
 0x46b   : > { %v2172_v22 = vpop.eup %2171  ;;  %1491 = vmatmul.mubr.f32.gmra.mrb[2].mxu1 %v1238_v51 }
 0x46c   : > { %1362 = vst [vmem:[%s2428_s18 + $0x20] sm:$0xff] %v1845_v53  ;;  %v1192_v38 = vpop.xlane.xlu1 %1191  ;;  %v1241_v57 = vmul.f32 %v2172_v22, %v2741_v11  ;;  %v1240_v24 = vmul.f32 %v2172_v22, %v2739_v48 }
 0x46d   : > { %2177 = vrcp.f32 %v1192_v38 }
 0x46e   : > { %1495 = vmatprep.mubr.f32.mxu1 %v1241_v57  ;;  %v1846_v30 = vpack.c.bf16 %v1241_v57, %v1240_v24 }
 0x46f   : > { %v2174_v25 = vpop.eup %2173  ;;  %1496 = vmatmul.mubr.f32.gmra.mrb[4].mxu1 %v1240_v24 }
 0x470   : > { %1363 = vst [vmem:[%s2428_s18 + $0x28] sm:$0xff] %v1846_v30  ;;  %v1195_v1 = vpop.xlane.xlu1 %1194  ;;  %v1243_v43 = vmul.f32 %v2174_v25, %v2749_v35  ;;  %v1242_v23 = vmul.f32 %v2174_v25, %v2747_v21 }
 0x471   : > { %2179 = vrcp.f32 %v1195_v1 }
 0x472   : > { %1500 = vmatprep.mubr.f32.mxu1 %v1243_v43  ;;  %v1847_v32 = vpack.c.bf16 %v1243_v43, %v1242_v23 }
 0x473   : > { %v2176_v56 = vpop.eup %2175  ;;  %1501 = vmatmul.mubr.f32.gmra.mrb[6].mxu1 %v1242_v23 }
 0x474   : > { %1364 = vst [vmem:[%s2428_s18 + $0x30] sm:$0xff] %v1847_v32  ;;  %v1198_v11 = vpop.xlane.xlu1 %1197  ;;  %v1245_v48 = vmul.f32 %v2176_v56, %v2757_v47  ;;  %v1244_v37 = vmul.f32 %v2176_v56, %v2755_v44 }
 0x475   : > { %2181 = vrcp.f32 %v1198_v11 }
 0x476   : > { %1505 = vmatprep.mubr.f32.mxu1 %v1245_v48  ;;  %v1848_v31 = vpack.c.bf16 %v1245_v48, %v1244_v37 }
 0x477   : > { %v2178_v52 = vpop.eup %2177  ;;  %1506 = vmatmul.mubr.f32.gmra.mrb[8].mxu1 %v1244_v37 }
 0x478   : > { %1365 = vst [vmem:[%s2428_s18 + $0x38] sm:$0xff] %v1848_v31  ;;  %v1201_v35 = vpop.xlane.xlu1 %1200  ;;  %v1247_v21 = vmul.f32 %v2178_v52, %v2765_v55  ;;  %v1246_v61 = vmul.f32 %v2178_v52, %v2763_v54 }
 0x479   : > { %2183 = vrcp.f32 %v1201_v35 }
 0x47a   : > { %1510 = vmatprep.mubr.f32.mxu1 %v1247_v21  ;;  %v1849_v63 = vpack.c.bf16 %v1247_v21, %v1246_v61 }
 0x47b   : > { %v2180_v36 = vpop.eup %2179  ;;  %1511 = vmatmul.mubr.f32.gmra.mrb[10].mxu1 %v1246_v61 }
 0x47c   : > { %1366 = vst [vmem:[%s2428_s18 + $0x40] sm:$0xff] %v1849_v63  ;;  %v1204_v47 = vpop.xlane.xlu1 %1203  ;;  %v1249_v44 = vmul.f32 %v2180_v36, %v2773_v0  ;;  %v1248_v8 = vmul.f32 %v2180_v36, %v2771_v4 }
 0x47d   : > { %2185 = vrcp.f32 %v1204_v47 }
 0x47e   : > { %1515 = vmatprep.mubr.f32.mxu1 %v1249_v44  ;;  %v1850_v9 = vpack.c.bf16 %v1249_v44, %v1248_v8 }
 0x47f   : > { %v2182_v59 = vpop.eup %2181  ;;  %1516 = vmatmul.mubr.f32.gmra.mrb[12].mxu1 %v1248_v8 }
 0x480   : > { %1367 = vst [vmem:[%s2428_s18 + $0x48] sm:$0xff] %v1850_v9  ;;  %v1207_v55 = vpop.xlane.xlu0 %1206  ;;  %v1251_v54 = vmul.f32 %v2182_v59, %v2781_v14  ;;  %v1250_v60 = vmul.f32 %v2182_v59, %v2779_v12 }
 0x481   : > { %2187 = vrcp.f32 %v1207_v55 }
 0x482   : > { %1520 = vmatprep.mubr.f32.mxu1 %v1251_v54  ;;  %v1851_v2 = vpack.c.bf16 %v1251_v54, %v1250_v60 }
 0x483   : > { %v2184_v41 = vpop.eup %2183  ;;  %1521 = vmatmul.mubr.f32.gmra.mrb[14].mxu1 %v1250_v60 }
 0x484   : > { %1368 = vst [vmem:[%s2428_s18 + $0x50] sm:$0xff] %v1851_v2  ;;  %v1210_v0 = vpop.xlane.xlu1 %1209  ;;  %v1253_v4 = vmul.f32 %v2184_v41, %v2789_v16  ;;  %v1252_v62 = vmul.f32 %v2184_v41, %v2787_v20 }
 0x485   : > { %2189 = vrcp.f32 %v1210_v0 }
 0x486   : > { %1525 = vmatprep.mubr.f32.mxu1 %v1253_v4  ;;  %v1852_v3 = vpack.c.bf16 %v1253_v4, %v1252_v62 }
 0x487   : > { %v2186_v5 = vpop.eup %2185  ;;  %1526 = vmatmul.mubr.f32.gmra.mrb[16].mxu1 %v1252_v62 }
 0x488   : > { %1369 = vst [vmem:[%s2428_s18 + $0x58] sm:$0xff] %v1852_v3  ;;  %v1213_v12 = vpop.xlane.xlu0 %1212  ;;  %v1255_v14 = vmul.f32 %v2186_v5, %v2797_v28  ;;  %v1254_v6 = vmul.f32 %v2186_v5, %v2795_v29 }
 0x489   : > { %2191 = vrcp.f32 %v1213_v12  ;;  %v1584_v12 = vstv %s1551_s14 }
 0x48a   : > { %1530 = vmatprep.mubr.f32.mxu1 %v1255_v14  ;;  %v1853_v7 = vpack.c.bf16 %v1255_v14, %v1254_v6 }
 0x48b   : > { %v2188_v18 = vpop.eup %2187  ;;  %1531 = vmatmul.mubr.f32.gmra.mrb[18].mxu1 %v1254_v6 }
 0x48c   : > { %1370 = vst [vmem:[%s2428_s18 + $0x60] sm:$0xff] %v1853_v7  ;;  %v1257_v20 = vmul.f32 %v2188_v18, %v2803_v34  ;;  %v1256_v16 = vmul.f32 %v2188_v18, %v2801_v58  ;;  %v2193_v7 = vld [vmem:[%s2522_s25] sm:$0xff] }
 0x48e   : > { %1535 = vmatprep.mubr.f32.mxu1 %v1257_v20  ;;  %v1854_v27 = vpack.c.bf16 %v1257_v20, %v1256_v16 }
 0x48f   : > { %v2190_v46 = vpop.eup %2189  ;;  %1536 = vmatmul.mubr.f32.gmra.mrb[20].mxu1 %v1256_v16 }
 0x490   : > { %1371 = vst [vmem:[%s2428_s18 + $0x68] sm:$0xff] %v1854_v27  ;;  %v1259_v28 = vmul.f32 %v2190_v46, %v2809_v42  ;;  %v1258_v29 = vmul.f32 %v2190_v46, %v2807_v40  ;;  %v2194_v27 = vld [vmem:[%s2522_s25 + $0x10] sm:$0xff] }
 0x492   : > { %1540 = vmatprep.mubr.f32.mxu1 %v1259_v28  ;;  %v1855_v10 = vpack.c.bf16 %v1259_v28, %v1258_v29 }
 0x493   : > { %v2192_v13 = vpop.eup %2191  ;;  %1541 = vmatmul.mubr.f32.gmra.mrb[22].mxu1 %v1258_v29 }
 0x494   : > { %1372 = vst [vmem:[%s2428_s18 + $0x70] sm:$0xff] %v1855_v10  ;;  %v1261_v39 = vmul.f32 %v2192_v13, %v2815_v50  ;;  %v1260_v34 = vmul.f32 %v2192_v13, %v2813_v45  ;;  %v2195_v10 = vld [vmem:[%s2522_s25 + $0x20] sm:$0xff] }
 0x496   : > { %1545 = vmatprep.mubr.f32.mxu1 %v1261_v39  ;;  %v1856_v58 = vpack.c.bf16 %v1261_v39, %v1260_v34 }
 0x497   : > { %1546 = vmatmul.mubr.f32.gmra.mrb[24].mxu1 %v1260_v34 }
 0x498   : > { %1373 = vst [vmem:[%s2428_s18 + $0x78] sm:$0xff] %v1856_v58  ;;  %v2196_v58 = vld [vmem:[%s2522_s25 + $0x30] sm:$0xff] }
 0x52e   : > { %v1890_v26 = vpop.f32.mrb[32].mxu0 }
 0x52f   : > { %v1891_v15 = vpop.f32.mrb[33].mxu0 }
 0x530   : > { %v1892_v19 = vadd.f32 %v1891_v15, %v1890_v26 }
 0x532   : > { %1552 = vxpose.xlu1.b32.start [1/16] (narrow) %v1892_v19, 32  ;;  %v1893_v42 = vpop.f32.mrb[34].mxu0 }
 0x533   : > { %v1894_v17 = vpop.f32.mrb[35].mxu0 }
 0x534   : > { %v1895_v40 = vadd.f32 %v1894_v17, %v1893_v42 }
 0x536   : > { %1553 = vxpose.xlu1.b32.cont [2/16] (narrow) %v1895_v40, 32  ;;  %v1896_v49 = vpop.f32.mrb[36].mxu0 }
 0x537   : > { %v1897_v33 = vpop.f32.mrb[37].mxu0 }
 0x538   : > { %v1898_v51 = vadd.f32 %v1897_v33, %v1896_v49 }
 0x53a   : > { %1554 = vxpose.xlu1.b32.cont [3/16] (narrow) %v1898_v51, 32  ;;  %v1899_v53 = vpop.f32.mrb[0].mxu1 }
 0x53b   : > { %v1900_v50 = vpop.f32.mrb[1].mxu1 }
 0x53c   : > { %v1901_v22 = vadd.f32 %v1900_v50, %v1899_v53 }
 0x53e   : > { %1555 = vxpose.xlu1.b32.cont [4/16] (narrow) %v1901_v22, 32  ;;  %v1902_v45 = vpop.f32.mrb[2].mxu1 }
 0x53f   : > { %v1903_v38 = vpop.f32.mrb[3].mxu1 }
 0x540   : > { %v1904_v57 = vadd.f32 %v1903_v38, %v1902_v45 }
 0x542   : > { %1556 = vxpose.xlu1.b32.cont [5/16] (narrow) %v1904_v57, 32  ;;  %v1905_v24 = vpop.f32.mrb[4].mxu1 }
 0x543   : > { %v1906_v30 = vpop.f32.mrb[5].mxu1 }
 0x544   : > { %v1907_v25 = vadd.f32 %v1906_v30, %v1905_v24 }
 0x546   : > { %1557 = vxpose.xlu1.b32.cont [6/16] (narrow) %v1907_v25, 32  ;;  %v1908_v1 = vpop.f32.mrb[6].mxu1 }
 0x547   : > { %v1909_v43 = vpop.f32.mrb[7].mxu1 }
 0x548   : > { %v1910_v23 = vadd.f32 %v1909_v43, %v1908_v1 }
 0x54a   : > { %1558 = vxpose.xlu1.b32.cont [7/16] (narrow) %v1910_v23, 32  ;;  %v1911_v32 = vpop.f32.mrb[8].mxu1 }
 0x54b   : > { %v1912_v56 = vpop.f32.mrb[9].mxu1 }
 0x54c   : > { %v1913_v11 = vadd.f32 %v1912_v56, %v1911_v32 }
 0x54e   : > { %1559 = vxpose.xlu1.b32.cont [8/16] (narrow) %v1913_v11, 32  ;;  %v1914_v48 = vpop.f32.mrb[10].mxu1 }
 0x54f   : > { %v1915_v37 = vpop.f32.mrb[11].mxu1 }
 0x550   : > { %v1916_v31 = vadd.f32 %v1915_v37, %v1914_v48 }
 0x552   : > { %1560 = vxpose.xlu1.b32.cont [9/16] (narrow) %v1916_v31, 32  ;;  %v1917_v52 = vpop.f32.mrb[12].mxu1 }
 0x553   : > { %v1918_v35 = vpop.f32.mrb[13].mxu1 }
 0x554   : > { %v1919_v21 = vadd.f32 %v1918_v35, %v1917_v52 }
 0x556   : > { %1561 = vxpose.xlu1.b32.cont [10/16] (narrow) %v1919_v21, 32  ;;  %v1920_v61 = vpop.f32.mrb[14].mxu1 }
 0x557   : > { %v1921_v63 = vpop.f32.mrb[15].mxu1 }
 0x558   : > { %v1922_v36 = vadd.f32 %v1921_v63, %v1920_v61 }
 0x55a   : > { %1562 = vxpose.xlu1.b32.cont [11/16] (narrow) %v1922_v36, 32  ;;  %v1923_v47 = vpop.f32.mrb[16].mxu1 }
 0x55b   : > { %v1924_v44 = vpop.f32.mrb[17].mxu1 }
 0x55c   : > { %v1925_v8 = vadd.f32 %v1924_v44, %v1923_v47 }
 0x55e   : > { %1563 = vxpose.xlu1.b32.cont [12/16] (narrow) %v1925_v8, 32  ;;  %v1926_v9 = vpop.f32.mrb[18].mxu1 }
 0x55f   : > { %v1927_v59 = vpop.f32.mrb[19].mxu1 }
 0x560   : > { %v1928_v55 = vadd.f32 %v1927_v59, %v1926_v9 }
 0x562   : > { %1564 = vxpose.xlu1.b32.cont [13/16] (narrow) %v1928_v55, 32  ;;  %v1929_v54 = vpop.f32.mrb[20].mxu1 }
 0x563   : > { %v1930_v60 = vpop.f32.mrb[21].mxu1 }
 0x564   : > { %v1931_v2 = vadd.f32 %v1930_v60, %v1929_v54 }
 0x566   : > { %v1932_v41 = vpop.f32.mrb[22].mxu1  ;;  %1565 = vxpose.xlu1.b32.cont [14/16] (narrow) %v1931_v2, 32 }
 0x567   : > { %v1933_v0 = vpop.f32.mrb[23].mxu1 }
 0x568   : > { %v1934_v4 = vadd.f32 %v1933_v0, %v1932_v41 }
 0x56a   : > { %1566 = vxpose.xlu1.b32.cont [15/16] (narrow) %v1934_v4, 32  ;;  %v1935_v62 = vpop.f32.mrb[24].mxu1 }
 0x56b   : > { %v1936_v3 = vpop.f32.mrb[25].mxu1 }
 0x56c   : > { %v1937_v5 = vadd.f32 %v1936_v3, %v1935_v62 }
 0x56e   : > { %1567 = vxpose.xlu1.b32.end [16/16] (narrow) %v1937_v5, 32 }
 0x5b2   : > { %v1568_v14 = vpop.trf.xlu1 }
 0x5b3   : > { %v1585_v6 = vmul.f32 %v1584_v12, %v1568_v14 }
 0x5b5   : > { %v1589_v18 = vadd.f32 %v2193_v7, %v1585_v6 }
 0x5b6   : > { %v1569_v20 = vpop.trf.xlu1 }
 0x5b7   : > { %1593 = vst [vmem:[%s2426_s17] sm:$0xff] %v1589_v18  ;;  %v1586_v16 = vmul.f32 %v1584_v12, %v1569_v20 }
 0x5b9   : > { %v1590_v46 = vadd.f32 %v2194_v27, %v1586_v16 }
 0x5ba   : > { %v1570_v28 = vpop.trf.xlu1 }
 0x5bb   : > { %1594 = vst [vmem:[%s2426_s17 + $0x8] sm:$0xff] %v1590_v46  ;;  %v1587_v29 = vmul.f32 %v1584_v12, %v1570_v28 }
 0x5bd   : > { %v1591_v13 = vadd.f32 %v2195_v10, %v1587_v29  ;;  %1608 = sbr.rel (!%p2394_p3) target bundleno = 1484 (0x5cc), region = 52 }
 0x5be   : > { %v1571_v39 = vpop.trf.xlu1  ;;  %v1646_v15 = vld [vmem:[%s2426_s17] sm:$0xff] (%p2394_p3) }
 0x5bf   : > { %1595 = vst [vmem:[%s2426_s17 + $0x10] sm:$0xff] %v1591_v13  ;;  %v1588_v34 = vmul.f32 %v1584_v12, %v1571_v39  ;;  %1647 = vst [vmem:[%s1612_s0] sm:$0xff] (%p2394_p3), %v1646_v15 }
 0x5c1   : > { %v1592_v26 = vadd.f32 %v2196_v58, %v1588_v34 }
 0x5c2   : > { %v1648_v19 = vld [vmem:[%s2426_s17 + $0x8] sm:$0xff] (%p2394_p3) }
 0x5c3   : > { %1596 = vst [vmem:[%s2426_s17 + $0x18] sm:$0xff] %v1592_v26  ;;  %1649 = vst [vmem:[%s1612_s0 + $0x10] sm:$0xff] (%p2394_p3), %v1648_v19 }
 0x5c6   : > { %v1650_v42 = vld [vmem:[%s2426_s17 + $0x10] sm:$0xff] }
 0x5c7   : > { %1651 = vst [vmem:[%s1612_s0 + $0x20] sm:$0xff] %v1650_v42 }
 0x5ca   : > { %v1652_v17 = vld [vmem:[%s2426_s17 + $0x18] sm:$0xff] }
 0x5cb   : > { %1653 = vst [vmem:[%s1612_s0 + $0x30] sm:$0xff] %v1652_v17 }
 0x5cc PF: > { %s1857_s25 = sshll.u32 %s2275_s29, 5  ;;  %s1836_s14 = sshll.u32 %s2279_s30, 6 }
 0x5cd   : > { %s1666_s11 = sadd.s32 %s1857_s25, %s1836_s14  ;;  %s1669_s5 = sshll.u32 %s2428_s18, 4  ;;  %s2890_s5 = int_to_ptr.vmem [resolvable:$true] %s1669_s5 }
 0x5ce   : > { %s1837_s1 = sshll.u32 %s1666_s11, 6  ;;  %s2197_s23 = scalar_lea.vmem %s2890_s5, 2048 }
 0x5cf   : > { %s2895_s22 = scalar_lea.hbm %s2955_s7, %s1837_s1  ;;  %p2198_p0 = scmp.ne.s32.totalorder %s2890_s5, %s2197_s23 }
 0x5d0   : > { %s2297_s29 = smov [#allocation7]  }
 0x5d1   : > { %p2199_p1 = pnand %p2198_p0, %p2394_p3  ;;  %s2201_s30 = sshll.u32 %s2297_s29, 4  ;;  %s2202_s30 = int_to_ptr.vmem [resolvable:$false] %s2201_s30 }
 0x5d2   : > { %s2203_s18 = scalar_lea.vmem %s2202_s30, 4096  ;;  %p2204_p4 = scmp.lt.s32.totalorder %s2890_s5, %s2202_s30 }
 0x5d3   : > { %p2200_p2 = pneg %p2199_p1  ;;  %p2205_p5 = scmp.lt.s32.totalorder %s2203_s18, %s2197_s23 }
 0x5d5   : > { %p2206_p6 = por %p2205_p5, %p2204_p4 }
 0x5d7   : > { %p2207_p7 = pnand %p2206_p6, %p2200_p2 }
 0x5d9   : > { %2210 = shalt.err (!%p2207_p7)
}
 0x5da   : > { %s2211_s1 = scalar_lea.hbm %s2895_s22, 2048  ;;  %s2215_s25 = scalar_lea.hbm %s2955_s7, 8192 }
 0x5db   : > { %p2212_p9 = scmp.ne.s32.totalorder %s2895_s22, %s2211_s1  ;;  %p2216_p12 = scmp.lt.u32.totalorder %s2895_s22, %s2955_s7 }
 0x5dc   : > { %p2217_p13 = scmp.lt.u32.totalorder %s2215_s25, %s2211_s1  ;;  %p2219_p1 = scmp.lt.u32.totalorder %s2211_s1, %s2895_s22 }
 0x5dd   : > { %p2213_p10 = pnand %p2212_p9, %p2394_p3 }
 0x5de   : > { %p2218_p0 = por %p2217_p13, %p2216_p12 }
 0x5df   : > { %p2214_p11 = pneg %p2213_p10 }
 0x5e0   : > { %p2220_p2 = por %p2219_p1, %p2218_p0 }
 0x5e2   : > { %p2221_p4 = pnand %p2220_p2, %p2214_p11 }
 0x5e4   : > { %2224 = shalt.err (!%p2221_p4)
}
 0x5e5   : > { %s2298_s17 = smov 128   ;;  %s2299_s19 = smov 8  }
 0x5e6   : > { %s2962_s23 = scalar_lea.sflag [#allocation8], %s2415_s21 }
 0x5e7   : > { %2018 = dma.vmem_to_hbm [thread:$0]  (%p2394_p3), %s2890_s5, 2048, %s2895_s22, %s2962_s23, %s2298_s17, %s2298_s17, %s2299_s19  }
 0x5e8 PF: > { %p2024_p5 = scmp.ge.s32.totalorder %s2291_s10, 2  ;;  %s1691_s29 = sand.u32 1, %s2263_s26  }
 0x5e9   : > { %s1692_s30 = scalar_lea.sflag [#allocation8], %s1691_s29 }
 0x5ea   : > { %p2021_p6 = pnand %p2024_p5, %p2403_p8 }
 0x5ec   : > { %2258 = dma.done.wait (!%p2021_p6), %s1692_s30, 2048  }
 0x5ed   : > { %2260 = vsyncadd (!%p2021_p6), %s1692_s30, 4294965248  ;;  %s22_s10 = sadd.s32 1, %s2291_s10   ;;  %s2963_s26 = smov %s2267_s27 }
 0x5ee   : > { %p19_p7 = scmp.ge.s32.totalorder %s22_s10, 6   ;;  %s2964_s27 = smov %s2271_s28 }
 0x5ef   : > { %s2965_s28 = smov %s2412_s20  ;;  %s2966_s29 = smov %s2283_s8 }
 0x5f0   : > { %s2967_s30 = smov %s2287_s9  ;;  %s2968_s8 = smov %s2971_s12 }
 0x5f1   : > { %s2969_s9 = smov %s2975_s13  ;;  %21 = sbr.rel (!%p19_p7) target bundleno = 9 (0x9), region = 134 }
 0x5f8   :  { %1697 = vsyncpa [#allocation8], 1 }
 0x5f9   :  { %1699 = vsyncpa [#allocation8 + $0x1], 1 }

</bundles_post_ra>
